<compile_context>
chip_gen: v6e
topology: v6e:2x2x1
jax: 0.10.0
libtpu: 0.0.40
codegen_flags: <defaults>
</compile_context>

<pallas_src>
import functools

import jax
import jax.numpy as jnp
from jax.experimental import pallas as pl
from jax.experimental.pallas import tpu as pltpu

LN_EPS = 1e-5


def _layernorm(x, w, b):
    # f32 statistics for accuracy
    mu = jnp.mean(x, axis=-1, keepdims=True)
    var = jnp.mean(jnp.square(x - mu), axis=-1, keepdims=True)
    return (x - mu) * jax.lax.rsqrt(var + LN_EPS) * w + b


def _gelu_exact(x):
    # exact GELU (erf), matching nn.GELU() default
    return 0.5 * x * (1.0 + jax.lax.erf(x * 0.7071067811865476))


def gpt2_model_kernel(num_heads, head_dim, num_layers, batch, seq,
                      x_ref,
                      ln1w_ref, ln1b_ref, wqkv_ref, bqkv_ref, wo_ref, bo_ref,
                      ln2w_ref, ln2b_ref, wfc_ref, bfc_ref, wp_ref, bp_ref,
                      lnfw_ref, lnfb_ref,
                      out_ref,
                      mask_ref):
    layer = pl.program_id(0)
    BS, H = out_ref.shape                     # BS = batch * seq (batch folded into M)

    # First layer: seed the residual stream (out_ref doubles as the resident
    # accumulator across the layer axis) and build the additive causal bias once.
    @pl.when(layer == 0)
    def _():
        out_ref[...] = x_ref[...]
        row = jax.lax.broadcasted_iota(jnp.int32, (seq, seq), 0)
        col = jax.lax.broadcasted_iota(jnp.int32, (seq, seq), 1)
        mask_ref[...] = jnp.where(row >= col, 0.0, -jnp.inf).astype(jnp.float32)

    x = out_ref[...]                          # (BS, H) f32 residual stream
    scale = head_dim ** (-0.5)

    # ---------------- attention sub-block: x + c_proj(attn(ln_1(x))) ----------------
    xn = _layernorm(x, ln1w_ref[0], ln1b_ref[0])
    qkv = jnp.dot(xn.astype(jnp.bfloat16), wqkv_ref[0],
                  preferred_element_type=jnp.float32) + bqkv_ref[0]       # (BS, 3H) f32
    q = qkv[:, 0:H] * scale                   # scale folded into q (not the scores)
    k = qkv[:, H:2 * H]
    v = qkv[:, 2 * H:3 * H]

    # Split heads into a (G, S, hd) batch with G = NH*B (head-major, batch-minor).
    def split_heads(t):
        return jnp.stack(
            [t[b * seq:(b + 1) * seq, h * head_dim:(h + 1) * head_dim]
             for h in range(num_heads) for b in range(batch)],
            axis=0).astype(jnp.bfloat16)                                  # (G, S, hd)

    qh, kh, vh = split_heads(q), split_heads(k), split_heads(v)

    scores = jnp.einsum("gqd,gkd->gqk", qh, kh,
                        preferred_element_type=jnp.float32)               # (G, S, S) f32
    scores = scores + mask_ref[...][None, :, :]                           # causal bias
    m = jnp.max(scores, axis=-1, keepdims=True)
    p = jnp.exp(scores - m)
    # EUP approx reciprocal instead of exact divide (~2^-12 rel err; inference OK).
    p = p * pl.reciprocal(jnp.sum(p, axis=-1, keepdims=True), approx=True)

    ctx = jnp.einsum("gqk,gkd->gqd", p.astype(jnp.bfloat16), vh,
                     preferred_element_type=jnp.float32)                  # (G, S, hd)

    # Merge-free c_proj: concat_h(ctx_h) @ Wo == sum_h ctx_h @ Wo[h*hd:(h+1)*hd, :].
    # No (S, H) scratch, no masked sub-lane stores, no reload.
    ctx_r = ctx.reshape(num_heads, BS, head_dim)          # (NH, BS, hd), rows = (b, s)
    attn_out = jnp.zeros((BS, H), jnp.float32)
    for h in range(num_heads):
        attn_out = attn_out + jnp.dot(
            ctx_r[h].astype(jnp.bfloat16),
            wo_ref[0][h * head_dim:(h + 1) * head_dim, :],
            preferred_element_type=jnp.float32)
    x = x + attn_out + bo_ref[0]

    # ---------------- MLP sub-block: x + c_proj(gelu(c_fc(ln_2(x)))) ----------------
    xn2 = _layernorm(x, ln2w_ref[0], ln2b_ref[0])
    hmid = _gelu_exact(jnp.dot(xn2.astype(jnp.bfloat16), wfc_ref[0],
                               preferred_element_type=jnp.float32) + bfc_ref[0])
    mlp_out = jnp.dot(hmid.astype(jnp.bfloat16), wp_ref[0],
                      preferred_element_type=jnp.float32) + bp_ref[0]
    x = x + mlp_out

    out_ref[...] = x                          # carry residual to the next layer

    # Final LayerNorm fused into the last layer iteration.
    @pl.when(layer == num_layers - 1)
    def _():
        out_ref[...] = _layernorm(x, lnfw_ref[...], lnfb_ref[...]).astype(out_ref.dtype)


def gpt2_forward(x, stacked, lnf_w, lnf_b, num_heads, head_dim):
    """x: (B, S, H) f32 embeddings; stacked: dict of per-layer params, leading layer dim."""
    B, S, H = x.shape
    names = ["ln1w", "ln1b", "wqkv", "bqkv", "wo", "bo",
             "ln2w", "ln2b", "wfc", "bfc", "wp", "bp"]
    params = [stacked[n] for n in names]
    num_layers = params[0].shape[0]

    x_flat = x.reshape(B * S, H)              # fold batch into the matmul M dimension

    def layer_spec(arr):
        # stacked param (L, d0, d1): fetch layer `l`'s slab once per layer step
        return pl.BlockSpec((1,) + arr.shape[1:], lambda l: (l, 0, 0))

    # TODO(synk): x_flat is only read at layer==0 but its block stays double-buffered
    # for all L steps; a pipeline_mode=pl.Buffered(1) hint (or input/output aliasing)
    # would reclaim that VMEM — negligible at these shapes.
    in_specs = ([pl.BlockSpec((B * S, H), lambda l: (0, 0))]
                + [layer_spec(w) for w in params]
                + [pl.BlockSpec((1, H), lambda l: (0, 0)),
                   pl.BlockSpec((1, H), lambda l: (0, 0))])

    out = pl.pallas_call(
        functools.partial(gpt2_model_kernel, num_heads, head_dim, num_layers, B, S),
        out_shape=jax.ShapeDtypeStruct((B * S, H), jnp.float32),
        grid=(num_layers,),
        in_specs=in_specs,
        # Constant block index along the layer axis -> output block stays resident in
        # VMEM across all layers and is written back to HBM exactly once.
        out_specs=pl.BlockSpec((B * S, H), lambda l: (0, 0)),
        scratch_shapes=[pltpu.VMEM((S, S), jnp.float32)],    # additive causal bias
        compiler_params=pltpu.CompilerParams(
            dimension_semantics=("arbitrary",),
            # 48 MiB leaves headroom on v7x's 64 MiB physical VMEM (v5e/v6e: 128 MiB).
            vmem_limit_bytes=48 * 1024 * 1024),
    )(x_flat, *params, lnf_w, lnf_b)
    return out.reshape(B, S, H)


def embed(input_ids, wte, wpe):
    # Embedding gather + positional add is glue (no matmul hot path); plain JAX.
    S = input_ids.shape[1]
    tok = jnp.take(wte, input_ids, axis=0)        # (B, S, H)
    pos = wpe[:S][None, :, :]                     # (1, S, H)
    return (tok + pos).astype(jnp.float32)        # embd_pdrop dropout = identity


if __name__ == "__main__":
    # Small synthetic GPT-2 config (lane-dense hidden): vocab=256, n_ctx=16,
    # n_embd=128, n_head=4; n_layer = n_head = 4 (reference stacks config.n_head blocks).
    B, S = 2, 8
    VOCAB, MAX_POS, H, NH = 256, 16, 128, 4
    HD = H // NH
    N_LAYERS = NH

    key = jax.random.PRNGKey(0)
    keys = jax.random.split(key, 3 + N_LAYERS)
    wte = 0.02 * jax.random.normal(keys[0], (VOCAB, H), jnp.float32)
    wpe = 0.02 * jax.random.normal(keys[1], (MAX_POS, H), jnp.float32)
    input_ids = jax.random.randint(keys[2], (B, S), 0, VOCAB)

    def init_block(k):
        ks = jax.random.split(k, 8)
        bf = jnp.bfloat16
        return dict(
            ln1w=jnp.ones((1, H), jnp.float32), ln1b=jnp.zeros((1, H), jnp.float32),
            wqkv=(0.02 * jax.random.normal(ks[0], (H, 3 * H), jnp.float32)).astype(bf),
            bqkv=0.02 * jax.random.normal(ks[1], (1, 3 * H), jnp.float32),
            wo=(0.02 * jax.random.normal(ks[2], (H, H), jnp.float32)).astype(bf),
            bo=0.02 * jax.random.normal(ks[3], (1, H), jnp.float32),
            ln2w=jnp.ones((1, H), jnp.float32), ln2b=jnp.zeros((1, H), jnp.float32),
            wfc=(0.02 * jax.random.normal(ks[4], (H, 4 * H), jnp.float32)).astype(bf),
            bfc=0.02 * jax.random.normal(ks[5], (1, 4 * H), jnp.float32),
            wp=(0.02 * jax.random.normal(ks[6], (4 * H, H), jnp.float32)).astype(bf),
            bp=0.02 * jax.random.normal(ks[7], (1, H), jnp.float32),
        )

    blocks = [init_block(keys[3 + i]) for i in range(N_LAYERS)]
    # Stack per-layer params with a leading layer dim for the fused layer-grid axis.
    stacked = {name: jnp.stack([blk[name] for blk in blocks], axis=0)
               for name in blocks[0]}
    lnf_w = jnp.ones((1, H), jnp.float32)
    lnf_b = jnp.zeros((1, H), jnp.float32)

    x = embed(input_ids, wte, wpe)
    out = gpt2_forward(x, stacked, lnf_w, lnf_b, NH, HD)

    jax.block_until_ready(out)
    assert out.shape == (B, S, H) and out.dtype == jnp.float32
    print("KERNEL_OK")
</pallas_src>

<mosaic_0001>
module attributes {stable_mosaic.version = 11 : i64} {
  func.func @gpt2_model_kernel(%arg0: i32, %arg1: memref<16x128xf32, #tpu.memory_space<vmem>>, %arg2: memref<1x1x128xf32, #tpu.memory_space<vmem>>, %arg3: memref<1x1x128xf32, #tpu.memory_space<vmem>>, %arg4: memref<1x128x384xbf16, #tpu.memory_space<vmem>>, %arg5: memref<1x1x384xf32, #tpu.memory_space<vmem>>, %arg6: memref<1x128x128xbf16, #tpu.memory_space<vmem>>, %arg7: memref<1x1x128xf32, #tpu.memory_space<vmem>>, %arg8: memref<1x1x128xf32, #tpu.memory_space<vmem>>, %arg9: memref<1x1x128xf32, #tpu.memory_space<vmem>>, %arg10: memref<1x128x512xbf16, #tpu.memory_space<vmem>>, %arg11: memref<1x1x512xf32, #tpu.memory_space<vmem>>, %arg12: memref<1x512x128xbf16, #tpu.memory_space<vmem>>, %arg13: memref<1x1x128xf32, #tpu.memory_space<vmem>>, %arg14: memref<1x128xf32, #tpu.memory_space<vmem>>, %arg15: memref<1x128xf32, #tpu.memory_space<vmem>>, %arg16: memref<16x128xf32, #tpu.memory_space<vmem>>, %arg17: memref<8x8xf32, #tpu.memory_space<vmem>>) attributes {dimension_semantics = [#tpu.dimension_semantics<arbitrary>], iteration_bounds = array<i64: 4>, scalar_prefetch = 0 : i64, scratch_operands = 1 : i64, tpu.core_type = #tpu.core_type<tc>, window_params = [{pipeline_mode = #tpu.pipeline_mode<synchronous>, transform_indices = @transform_0, window_bounds = array<i64: 16, 128>}, {transform_indices = @transform_1, window_bounds = array<i64: 1, 1, 128>}, {transform_indices = @transform_2, window_bounds = array<i64: 1, 1, 128>}, {transform_indices = @transform_3, window_bounds = array<i64: 1, 128, 384>}, {transform_indices = @transform_4, window_bounds = array<i64: 1, 1, 384>}, {transform_indices = @transform_5, window_bounds = array<i64: 1, 128, 128>}, {transform_indices = @transform_6, window_bounds = array<i64: 1, 1, 128>}, {transform_indices = @transform_7, window_bounds = array<i64: 1, 1, 128>}, {transform_indices = @transform_8, window_bounds = array<i64: 1, 1, 128>}, {transform_indices = @transform_9, window_bounds = array<i64: 1, 128, 512>}, {transform_indices = @transform_10, window_bounds = array<i64: 1, 1, 512>}, {transform_indices = @transform_11, window_bounds = array<i64: 1, 512, 128>}, {transform_indices = @transform_12, window_bounds = array<i64: 1, 1, 128>}, {pipeline_mode = #tpu.pipeline_mode<synchronous>, transform_indices = @transform_13, window_bounds = array<i64: 1, 128>}, {pipeline_mode = #tpu.pipeline_mode<synchronous>, transform_indices = @transform_14, window_bounds = array<i64: 1, 128>}, {pipeline_mode = #tpu.pipeline_mode<synchronous>, transform_indices = @transform_15, window_bounds = array<i64: 16, 128>}]} {
    %c0_i32 = arith.constant 0 : i32
    %0 = arith.cmpi eq, %arg0, %c0_i32 : i32
    %1 = arith.extui %0 : i1 to i32
    %c0_i32_0 = arith.constant 0 : i32
    %2 = arith.cmpi ne, %1, %c0_i32_0 : i32
    scf.if %2 {
      %c0_77 = arith.constant 0 : index
      %c0_78 = arith.constant 0 : index
      %208 = vector.load %arg1[%c0_77, %c0_78] : memref<16x128xf32, #tpu.memory_space<vmem>>, vector<16x128xf32>
      %c0_79 = arith.constant 0 : index
      %c0_80 = arith.constant 0 : index
      %209 = vector.load %arg16[%c0_79, %c0_80] : memref<16x128xf32, #tpu.memory_space<vmem>>, vector<16x128xf32>
      tpu.vector_store %arg16[%c0_79, %c0_80], %208 {strides = array<i32>} : memref<16x128xf32, #tpu.memory_space<vmem>>, vector<16x128xf32>,
      %210 = tpu.iota {dimensions = array<i32: 0>} : vector<8x8xi32>
      %211 = tpu.iota {dimensions = array<i32: 1>} : vector<8x8xi32>
      %212 = arith.cmpi sge, %210, %211 : vector<8x8xi32>
      %cst_81 = arith.constant 0.000000e+00 : f32
      %cst_82 = arith.constant 0xFF800000 : f32
      %213 = vector.broadcast %cst_81 : f32 to vector<8x8xf32>
      %214 = vector.broadcast %cst_82 : f32 to vector<8x8xf32>
      %215 = arith.select %212, %213, %214 : vector<8x8xi1>, vector<8x8xf32>
      %c0_83 = arith.constant 0 : index
      %c0_84 = arith.constant 0 : index
      %216 = vector.load %arg17[%c0_83, %c0_84] : memref<8x8xf32, #tpu.memory_space<vmem>>, vector<8x8xf32>
      tpu.vector_store %arg17[%c0_83, %c0_84], %215 {strides = array<i32>} : memref<8x8xf32, #tpu.memory_space<vmem>>, vector<8x8xf32>,
    } else {
    }
    %c0 = arith.constant 0 : index
    %c0_1 = arith.constant 0 : index
    %3 = vector.load %arg16[%c0, %c0_1] : memref<16x128xf32, #tpu.memory_space<vmem>>, vector<16x128xf32>
    %c0_2 = arith.constant 0 : index
    %c0_3 = arith.constant 0 : index
    %c0_4 = arith.constant 0 : index
    %4 = vector.load %arg2[%c0_2, %c0_3, %c0_4] : memref<1x1x128xf32, #tpu.memory_space<vmem>>, vector<1x1x128xf32>
    %5 = vector.shape_cast %4 : vector<1x1x128xf32> to vector<1x128xf32>
    %c0_5 = arith.constant 0 : index
    %c0_6 = arith.constant 0 : index
    %c0_7 = arith.constant 0 : index
    %6 = vector.load %arg3[%c0_5, %c0_6, %c0_7] : memref<1x1x128xf32, #tpu.memory_space<vmem>>, vector<1x1x128xf32>
    %7 = vector.shape_cast %6 : vector<1x1x128xf32> to vector<1x128xf32>
    %cst = arith.constant dense<0.000000e+00> : vector<16xf32>
    %8 = vector.multi_reduction <add>, %3, %cst [1] : vector<16x128xf32> to vector<16xf32>
    %9 = vector.shape_cast %8 : vector<16xf32> to vector<16x1xf32>
    %cst_8 = arith.constant 1.280000e+02 : f32
    %10 = vector.broadcast %cst_8 : f32 to vector<16x1xf32>
    %11 = arith.divf %9, %10 : vector<16x1xf32>
    %12 = vector.broadcast %11 : vector<16x1xf32> to vector<16x128xf32>
    %13 = arith.subf %3, %12 : vector<16x128xf32>
    %14 = arith.mulf %13, %13 : vector<16x128xf32>
    %cst_9 = arith.constant dense<0.000000e+00> : vector<16xf32>
    %15 = vector.multi_reduction <add>, %14, %cst_9 [1] : vector<16x128xf32> to vector<16xf32>
    %16 = vector.shape_cast %15 : vector<16xf32> to vector<16x1xf32>
    %cst_10 = arith.constant 1.280000e+02 : f32
    %17 = vector.broadcast %cst_10 : f32 to vector<16x1xf32>
    %18 = arith.divf %16, %17 : vector<16x1xf32>
    %19 = vector.broadcast %11 : vector<16x1xf32> to vector<16x128xf32>
    %20 = arith.subf %3, %19 : vector<16x128xf32>
    %cst_11 = arith.constant 9.99999974E-6 : f32
    %21 = vector.broadcast %cst_11 : f32 to vector<16x1xf32>
    %22 = arith.addf %18, %21 : vector<16x1xf32>
    %23 = math.rsqrt %22 : vector<16x1xf32>
    %24 = vector.broadcast %23 : vector<16x1xf32> to vector<16x128xf32>
    %25 = arith.mulf %20, %24 : vector<16x128xf32>
    %26 = vector.broadcast %5 : vector<1x128xf32> to vector<16x128xf32>
    %27 = arith.mulf %25, %26 : vector<16x128xf32>
    %28 = vector.broadcast %7 : vector<1x128xf32> to vector<16x128xf32>
    %29 = arith.addf %27, %28 : vector<16x128xf32>
    %30 = arith.truncf %29 : vector<16x128xf32> to vector<16x128xbf16>
    %c0_12 = arith.constant 0 : index
    %c0_13 = arith.constant 0 : index
    %c0_14 = arith.constant 0 : index
    %31 = vector.load %arg4[%c0_12, %c0_13, %c0_14] : memref<1x128x384xbf16, #tpu.memory_space<vmem>>, vector<1x128x384xbf16>
    %32 = vector.shape_cast %31 : vector<1x128x384xbf16> to vector<128x384xbf16>
    %cst_15 = arith.constant dense<0.000000e+00> : vector<16x384xf32>
    %33 = tpu.matmul %30, %32, %cst_15 {dimension_numbers = #tpu.dot_dimension_numbers<[1], [0], [0], [1], [0, 0, 1, 1], [], []>} : vector<16x128xbf16>, vector<128x384xbf16>, vector<16x384xf32> -> vector<16x384xf32>
    %c0_16 = arith.constant 0 : index
    %c0_17 = arith.constant 0 : index
    %c0_18 = arith.constant 0 : index
    %34 = vector.load %arg5[%c0_16, %c0_17, %c0_18] : memref<1x1x384xf32, #tpu.memory_space<vmem>>, vector<1x1x384xf32>
    %35 = vector.shape_cast %34 : vector<1x1x384xf32> to vector<1x384xf32>
    %36 = vector.broadcast %35 : vector<1x384xf32> to vector<16x384xf32>
    %37 = arith.addf %33, %36 : vector<16x384xf32>
    %38 = vector.extract_strided_slice %37 {offsets = [0, 0], sizes = [16, 128], strides = [1, 1]} : vector<16x384xf32> to vector<16x128xf32>
    %cst_19 = arith.constant 0.176776692 : f32
    %39 = vector.broadcast %cst_19 : f32 to vector<16x128xf32>
    %40 = arith.mulf %38, %39 : vector<16x128xf32>
    %41 = vector.extract_strided_slice %37 {offsets = [0, 128], sizes = [16, 128], strides = [1, 1]} : vector<16x384xf32> to vector<16x128xf32>
    %42 = vector.extract_strided_slice %37 {offsets = [0, 256], sizes = [16, 128], strides = [1, 1]} : vector<16x384xf32> to vector<16x128xf32>
    %43 = vector.extract_strided_slice %40 {offsets = [0, 0], sizes = [8, 32], strides = [1, 1]} : vector<16x128xf32> to vector<8x32xf32>
    %44 = vector.extract_strided_slice %40 {offsets = [8, 0], sizes = [8, 32], strides = [1, 1]} : vector<16x128xf32> to vector<8x32xf32>
    %45 = vector.extract_strided_slice %40 {offsets = [0, 32], sizes = [8, 32], strides = [1, 1]} : vector<16x128xf32> to vector<8x32xf32>
    %46 = vector.extract_strided_slice %40 {offsets = [8, 32], sizes = [8, 32], strides = [1, 1]} : vector<16x128xf32> to vector<8x32xf32>
    %47 = vector.extract_strided_slice %40 {offsets = [0, 64], sizes = [8, 32], strides = [1, 1]} : vector<16x128xf32> to vector<8x32xf32>
    %48 = vector.extract_strided_slice %40 {offsets = [8, 64], sizes = [8, 32], strides = [1, 1]} : vector<16x128xf32> to vector<8x32xf32>
    %49 = vector.extract_strided_slice %40 {offsets = [0, 96], sizes = [8, 32], strides = [1, 1]} : vector<16x128xf32> to vector<8x32xf32>
    %50 = vector.extract_strided_slice %40 {offsets = [8, 96], sizes = [8, 32], strides = [1, 1]} : vector<16x128xf32> to vector<8x32xf32>
    %51 = vector.shape_cast %43 : vector<8x32xf32> to vector<1x8x32xf32>
    %52 = vector.shape_cast %44 : vector<8x32xf32> to vector<1x8x32xf32>
    %53 = vector.shape_cast %45 : vector<8x32xf32> to vector<1x8x32xf32>
    %54 = vector.shape_cast %46 : vector<8x32xf32> to vector<1x8x32xf32>
    %55 = vector.shape_cast %47 : vector<8x32xf32> to vector<1x8x32xf32>
    %56 = vector.shape_cast %48 : vector<8x32xf32> to vector<1x8x32xf32>
    %57 = vector.shape_cast %49 : vector<8x32xf32> to vector<1x8x32xf32>
    %58 = vector.shape_cast %50 : vector<8x32xf32> to vector<1x8x32xf32>
    %59 = tpu.concatenate %51, %52, %53, %54, %55, %56, %57, %58 in 0 : vector<1x8x32xf32>, vector<1x8x32xf32>, vector<1x8x32xf32>, vector<1x8x32xf32>, vector<1x8x32xf32>, vector<1x8x32xf32>, vector<1x8x32xf32>, vector<1x8x32xf32> -> vector<8x8x32xf32>
    %60 = arith.truncf %59 : vector<8x8x32xf32> to vector<8x8x32xbf16>
    %61 = vector.extract_strided_slice %41 {offsets = [0, 0], sizes = [8, 32], strides = [1, 1]} : vector<16x128xf32> to vector<8x32xf32>
    %62 = vector.extract_strided_slice %41 {offsets = [8, 0], sizes = [8, 32], strides = [1, 1]} : vector<16x128xf32> to vector<8x32xf32>
    %63 = vector.extract_strided_slice %41 {offsets = [0, 32], sizes = [8, 32], strides = [1, 1]} : vector<16x128xf32> to vector<8x32xf32>
    %64 = vector.extract_strided_slice %41 {offsets = [8, 32], sizes = [8, 32], strides = [1, 1]} : vector<16x128xf32> to vector<8x32xf32>
    %65 = vector.extract_strided_slice %41 {offsets = [0, 64], sizes = [8, 32], strides = [1, 1]} : vector<16x128xf32> to vector<8x32xf32>
    %66 = vector.extract_strided_slice %41 {offsets = [8, 64], sizes = [8, 32], strides = [1, 1]} : vector<16x128xf32> to vector<8x32xf32>
    %67 = vector.extract_strided_slice %41 {offsets = [0, 96], sizes = [8, 32], strides = [1, 1]} : vector<16x128xf32> to vector<8x32xf32>
    %68 = vector.extract_strided_slice %41 {offsets = [8, 96], sizes = [8, 32], strides = [1, 1]} : vector<16x128xf32> to vector<8x32xf32>
    %69 = vector.shape_cast %61 : vector<8x32xf32> to vector<1x8x32xf32>
    %70 = vector.shape_cast %62 : vector<8x32xf32> to vector<1x8x32xf32>
    %71 = vector.shape_cast %63 : vector<8x32xf32> to vector<1x8x32xf32>
    %72 = vector.shape_cast %64 : vector<8x32xf32> to vector<1x8x32xf32>
    %73 = vector.shape_cast %65 : vector<8x32xf32> to vector<1x8x32xf32>
    %74 = vector.shape_cast %66 : vector<8x32xf32> to vector<1x8x32xf32>
    %75 = vector.shape_cast %67 : vector<8x32xf32> to vector<1x8x32xf32>
    %76 = vector.shape_cast %68 : vector<8x32xf32> to vector<1x8x32xf32>
    %77 = tpu.concatenate %69, %70, %71, %72, %73, %74, %75, %76 in 0 : vector<1x8x32xf32>, vector<1x8x32xf32>, vector<1x8x32xf32>, vector<1x8x32xf32>, vector<1x8x32xf32>, vector<1x8x32xf32>, vector<1x8x32xf32>, vector<1x8x32xf32> -> vector<8x8x32xf32>
    %78 = arith.truncf %77 : vector<8x8x32xf32> to vector<8x8x32xbf16>
    %79 = vector.extract_strided_slice %42 {offsets = [0, 0], sizes = [8, 32], strides = [1, 1]} : vector<16x128xf32> to vector<8x32xf32>
    %80 = vector.extract_strided_slice %42 {offsets = [8, 0], sizes = [8, 32], strides = [1, 1]} : vector<16x128xf32> to vector<8x32xf32>
    %81 = vector.extract_strided_slice %42 {offsets = [0, 32], sizes = [8, 32], strides = [1, 1]} : vector<16x128xf32> to vector<8x32xf32>
    %82 = vector.extract_strided_slice %42 {offsets = [8, 32], sizes = [8, 32], strides = [1, 1]} : vector<16x128xf32> to vector<8x32xf32>
    %83 = vector.extract_strided_slice %42 {offsets = [0, 64], sizes = [8, 32], strides = [1, 1]} : vector<16x128xf32> to vector<8x32xf32>
    %84 = vector.extract_strided_slice %42 {offsets = [8, 64], sizes = [8, 32], strides = [1, 1]} : vector<16x128xf32> to vector<8x32xf32>
    %85 = vector.extract_strided_slice %42 {offsets = [0, 96], sizes = [8, 32], strides = [1, 1]} : vector<16x128xf32> to vector<8x32xf32>
    %86 = vector.extract_strided_slice %42 {offsets = [8, 96], sizes = [8, 32], strides = [1, 1]} : vector<16x128xf32> to vector<8x32xf32>
    %87 = vector.shape_cast %79 : vector<8x32xf32> to vector<1x8x32xf32>
    %88 = vector.shape_cast %80 : vector<8x32xf32> to vector<1x8x32xf32>
    %89 = vector.shape_cast %81 : vector<8x32xf32> to vector<1x8x32xf32>
    %90 = vector.shape_cast %82 : vector<8x32xf32> to vector<1x8x32xf32>
    %91 = vector.shape_cast %83 : vector<8x32xf32> to vector<1x8x32xf32>
    %92 = vector.shape_cast %84 : vector<8x32xf32> to vector<1x8x32xf32>
    %93 = vector.shape_cast %85 : vector<8x32xf32> to vector<1x8x32xf32>
    %94 = vector.shape_cast %86 : vector<8x32xf32> to vector<1x8x32xf32>
    %95 = tpu.concatenate %87, %88, %89, %90, %91, %92, %93, %94 in 0 : vector<1x8x32xf32>, vector<1x8x32xf32>, vector<1x8x32xf32>, vector<1x8x32xf32>, vector<1x8x32xf32>, vector<1x8x32xf32>, vector<1x8x32xf32>, vector<1x8x32xf32> -> vector<8x8x32xf32>
    %96 = arith.truncf %95 : vector<8x8x32xf32> to vector<8x8x32xbf16>
    "tpu.trace_start"() <{level = 10 : i32, message = "gqd,gkd->gqk"}> : () -> ()
    %cst_20 = arith.constant dense<0.000000e+00> : vector<8x8x8xf32>
    %97 = tpu.matmul %60, %78, %cst_20 {dimension_numbers = #tpu.dot_dimension_numbers<[2], [2], [1], [1], [0, 0, 0, 1, 1, 1], [0], [0]>} : vector<8x8x32xbf16>, vector<8x8x32xbf16>, vector<8x8x8xf32> -> vector<8x8x8xf32>
    "tpu.trace_stop"() : () -> ()
    %c0_21 = arith.constant 0 : index
    %c0_22 = arith.constant 0 : index
    %98 = vector.load %arg17[%c0_21, %c0_22] : memref<8x8xf32, #tpu.memory_space<vmem>>, vector<8x8xf32>
    %99 = vector.shape_cast %98 : vector<8x8xf32> to vector<1x8x8xf32>
    %100 = vector.broadcast %99 : vector<1x8x8xf32> to vector<8x8x8xf32>
    %101 = arith.addf %97, %100 : vector<8x8x8xf32>
    %cst_23 = arith.constant dense<0xFF800000> : vector<8x8xf32>
    %102 = vector.multi_reduction <maximumf>, %101, %cst_23 [2] : vector<8x8x8xf32> to vector<8x8xf32>
    %103 = vector.shape_cast %102 : vector<8x8xf32> to vector<8x8x1xf32>
    %104 = vector.broadcast %103 : vector<8x8x1xf32> to vector<8x8x8xf32>
    %105 = arith.subf %101, %104 : vector<8x8x8xf32>
    %106 = math.exp %105 : vector<8x8x8xf32>
    %cst_24 = arith.constant dense<0.000000e+00> : vector<8x8xf32>
    %107 = vector.multi_reduction <add>, %106, %cst_24 [2] : vector<8x8x8xf32> to vector<8x8xf32>
    %108 = vector.shape_cast %107 : vector<8x8xf32> to vector<8x8x1xf32>
    %109 = tpu.reciprocal %108 {approx = true} : vector<8x8x1xf32> -> vector<8x8x1xf32>
    %110 = vector.broadcast %109 : vector<8x8x1xf32> to vector<8x8x8xf32>
    %111 = arith.mulf %106, %110 : vector<8x8x8xf32>
    %112 = arith.truncf %111 : vector<8x8x8xf32> to vector<8x8x8xbf16>
    "tpu.trace_start"() <{level = 10 : i32, message = "gqk,gkd->gqd"}> : () -> ()
    %cst_25 = arith.constant dense<0.000000e+00> : vector<8x8x32xf32>
    %113 = tpu.matmul %112, %96, %cst_25 {dimension_numbers = #tpu.dot_dimension_numbers<[2], [1], [1], [2], [0, 0, 0, 1, 1, 2], [0], [0]>} : vector<8x8x8xbf16>, vector<8x8x32xbf16>, vector<8x8x32xf32> -> vector<8x8x32xf32>
    "tpu.trace_stop"() : () -> ()
    %114 = vector.shape_cast %113 : vector<8x8x32xf32> to vector<4x16x32xf32>
    %cst_26 = arith.constant 0.000000e+00 : f32
    %115 = vector.broadcast %cst_26 : f32 to vector<16x128xf32>
    %116 = vector.extract_strided_slice %114 {offsets = [0, 0, 0], sizes = [1, 16, 32], strides = [1, 1, 1]} : vector<4x16x32xf32> to vector<1x16x32xf32>
    %117 = vector.shape_cast %116 : vector<1x16x32xf32> to vector<16x32xf32>
    %118 = arith.truncf %117 : vector<16x32xf32> to vector<16x32xbf16>
    %c0_27 = arith.constant 0 : index
    %c0_28 = arith.constant 0 : index
    %c0_29 = arith.constant 0 : index
    %119 = vector.load %arg6[%c0_27, %c0_28, %c0_29] : memref<1x128x128xbf16, #tpu.memory_space<vmem>>, vector<1x128x128xbf16>
    %120 = vector.shape_cast %119 : vector<1x128x128xbf16> to vector<128x128xbf16>
    %121 = vector.extract_strided_slice %120 {offsets = [0, 0], sizes = [32, 128], strides = [1, 1]} : vector<128x128xbf16> to vector<32x128xbf16>
    %cst_30 = arith.constant dense<0.000000e+00> : vector<16x128xf32>
    %122 = tpu.matmul %118, %121, %cst_30 {dimension_numbers = #tpu.dot_dimension_numbers<[1], [0], [0], [1], [0, 0, 1, 1], [], []>} : vector<16x32xbf16>, vector<32x128xbf16>, vector<16x128xf32> -> vector<16x128xf32>
    %123 = arith.addf %115, %122 : vector<16x128xf32>
    %124 = vector.extract_strided_slice %114 {offsets = [1, 0, 0], sizes = [1, 16, 32], strides = [1, 1, 1]} : vector<4x16x32xf32> to vector<1x16x32xf32>
    %125 = vector.shape_cast %124 : vector<1x16x32xf32> to vector<16x32xf32>
    %126 = arith.truncf %125 : vector<16x32xf32> to vector<16x32xbf16>
    %c0_31 = arith.constant 0 : index
    %c0_32 = arith.constant 0 : index
    %c0_33 = arith.constant 0 : index
    %127 = vector.load %arg6[%c0_31, %c0_32, %c0_33] : memref<1x128x128xbf16, #tpu.memory_space<vmem>>, vector<1x128x128xbf16>
    %128 = vector.shape_cast %127 : vector<1x128x128xbf16> to vector<128x128xbf16>
    %129 = vector.extract_strided_slice %128 {offsets = [32, 0], sizes = [32, 128], strides = [1, 1]} : vector<128x128xbf16> to vector<32x128xbf16>
    %cst_34 = arith.constant dense<0.000000e+00> : vector<16x128xf32>
    %130 = tpu.matmul %126, %129, %cst_34 {dimension_numbers = #tpu.dot_dimension_numbers<[1], [0], [0], [1], [0, 0, 1, 1], [], []>} : vector<16x32xbf16>, vector<32x128xbf16>, vector<16x128xf32> -> vector<16x128xf32>
    %131 = arith.addf %123, %130 : vector<16x128xf32>
    %132 = vector.extract_strided_slice %114 {offsets = [2, 0, 0], sizes = [1, 16, 32], strides = [1, 1, 1]} : vector<4x16x32xf32> to vector<1x16x32xf32>
    %133 = vector.shape_cast %132 : vector<1x16x32xf32> to vector<16x32xf32>
    %134 = arith.truncf %133 : vector<16x32xf32> to vector<16x32xbf16>
    %c0_35 = arith.constant 0 : index
    %c0_36 = arith.constant 0 : index
    %c0_37 = arith.constant 0 : index
    %135 = vector.load %arg6[%c0_35, %c0_36, %c0_37] : memref<1x128x128xbf16, #tpu.memory_space<vmem>>, vector<1x128x128xbf16>
    %136 = vector.shape_cast %135 : vector<1x128x128xbf16> to vector<128x128xbf16>
    %137 = vector.extract_strided_slice %136 {offsets = [64, 0], sizes = [32, 128], strides = [1, 1]} : vector<128x128xbf16> to vector<32x128xbf16>
    %cst_38 = arith.constant dense<0.000000e+00> : vector<16x128xf32>
    %138 = tpu.matmul %134, %137, %cst_38 {dimension_numbers = #tpu.dot_dimension_numbers<[1], [0], [0], [1], [0, 0, 1, 1], [], []>} : vector<16x32xbf16>, vector<32x128xbf16>, vector<16x128xf32> -> vector<16x128xf32>
    %139 = arith.addf %131, %138 : vector<16x128xf32>
    %140 = vector.extract_strided_slice %114 {offsets = [3, 0, 0], sizes = [1, 16, 32], strides = [1, 1, 1]} : vector<4x16x32xf32> to vector<1x16x32xf32>
    %141 = vector.shape_cast %140 : vector<1x16x32xf32> to vector<16x32xf32>
    %142 = arith.truncf %141 : vector<16x32xf32> to vector<16x32xbf16>
    %c0_39 = arith.constant 0 : index
    %c0_40 = arith.constant 0 : index
    %c0_41 = arith.constant 0 : index
    %143 = vector.load %arg6[%c0_39, %c0_40, %c0_41] : memref<1x128x128xbf16, #tpu.memory_space<vmem>>, vector<1x128x128xbf16>
    %144 = vector.shape_cast %143 : vector<1x128x128xbf16> to vector<128x128xbf16>
    %145 = vector.extract_strided_slice %144 {offsets = [96, 0], sizes = [32, 128], strides = [1, 1]} : vector<128x128xbf16> to vector<32x128xbf16>
    %cst_42 = arith.constant dense<0.000000e+00> : vector<16x128xf32>
    %146 = tpu.matmul %142, %145, %cst_42 {dimension_numbers = #tpu.dot_dimension_numbers<[1], [0], [0], [1], [0, 0, 1, 1], [], []>} : vector<16x32xbf16>, vector<32x128xbf16>, vector<16x128xf32> -> vector<16x128xf32>
    %147 = arith.addf %139, %146 : vector<16x128xf32>
    %148 = arith.addf %3, %147 : vector<16x128xf32>
    %c0_43 = arith.constant 0 : index
    %c0_44 = arith.constant 0 : index
    %c0_45 = arith.constant 0 : index
    %149 = vector.load %arg7[%c0_43, %c0_44, %c0_45] : memref<1x1x128xf32, #tpu.memory_space<vmem>>, vector<1x1x128xf32>
    %150 = vector.shape_cast %149 : vector<1x1x128xf32> to vector<1x128xf32>
    %151 = vector.broadcast %150 : vector<1x128xf32> to vector<16x128xf32>
    %152 = arith.addf %148, %151 : vector<16x128xf32>
    %c0_46 = arith.constant 0 : index
    %c0_47 = arith.constant 0 : index
    %c0_48 = arith.constant 0 : index
    %153 = vector.load %arg8[%c0_46, %c0_47, %c0_48] : memref<1x1x128xf32, #tpu.memory_space<vmem>>, vector<1x1x128xf32>
    %154 = vector.shape_cast %153 : vector<1x1x128xf32> to vector<1x128xf32>
    %c0_49 = arith.constant 0 : index
    %c0_50 = arith.constant 0 : index
    %c0_51 = arith.constant 0 : index
    %155 = vector.load %arg9[%c0_49, %c0_50, %c0_51] : memref<1x1x128xf32, #tpu.memory_space<vmem>>, vector<1x1x128xf32>
    %156 = vector.shape_cast %155 : vector<1x1x128xf32> to vector<1x128xf32>
    %cst_52 = arith.constant dense<0.000000e+00> : vector<16xf32>
    %157 = vector.multi_reduction <add>, %152, %cst_52 [1] : vector<16x128xf32> to vector<16xf32>
    %158 = vector.shape_cast %157 : vector<16xf32> to vector<16x1xf32>
    %cst_53 = arith.constant 1.280000e+02 : f32
    %159 = vector.broadcast %cst_53 : f32 to vector<16x1xf32>
    %160 = arith.divf %158, %159 : vector<16x1xf32>
    %161 = vector.broadcast %160 : vector<16x1xf32> to vector<16x128xf32>
    %162 = arith.subf %152, %161 : vector<16x128xf32>
    %163 = arith.mulf %162, %162 : vector<16x128xf32>
    %cst_54 = arith.constant dense<0.000000e+00> : vector<16xf32>
    %164 = vector.multi_reduction <add>, %163, %cst_54 [1] : vector<16x128xf32> to vector<16xf32>
    %165 = vector.shape_cast %164 : vector<16xf32> to vector<16x1xf32>
    %cst_55 = arith.constant 1.280000e+02 : f32
    %166 = vector.broadcast %cst_55 : f32 to vector<16x1xf32>
    %167 = arith.divf %165, %166 : vector<16x1xf32>
    %168 = vector.broadcast %160 : vector<16x1xf32> to vector<16x128xf32>
    %169 = arith.subf %152, %168 : vector<16x128xf32>
    %cst_56 = arith.constant 9.99999974E-6 : f32
    %170 = vector.broadcast %cst_56 : f32 to vector<16x1xf32>
    %171 = arith.addf %167, %170 : vector<16x1xf32>
    %172 = math.rsqrt %171 : vector<16x1xf32>
    %173 = vector.broadcast %172 : vector<16x1xf32> to vector<16x128xf32>
    %174 = arith.mulf %169, %173 : vector<16x128xf32>
    %175 = vector.broadcast %154 : vector<1x128xf32> to vector<16x128xf32>
    %176 = arith.mulf %174, %175 : vector<16x128xf32>
    %177 = vector.broadcast %156 : vector<1x128xf32> to vector<16x128xf32>
    %178 = arith.addf %176, %177 : vector<16x128xf32>
    %179 = arith.truncf %178 : vector<16x128xf32> to vector<16x128xbf16>
    %c0_57 = arith.constant 0 : index
    %c0_58 = arith.constant 0 : index
    %c0_59 = arith.constant 0 : index
    %180 = vector.load %arg10[%c0_57, %c0_58, %c0_59] : memref<1x128x512xbf16, #tpu.memory_space<vmem>>, vector<1x128x512xbf16>
    %181 = vector.shape_cast %180 : vector<1x128x512xbf16> to vector<128x512xbf16>
    %cst_60 = arith.constant dense<0.000000e+00> : vector<16x512xf32>
    %182 = tpu.matmul %179, %181, %cst_60 {dimension_numbers = #tpu.dot_dimension_numbers<[1], [0], [0], [1], [0, 0, 1, 1], [], []>} : vector<16x128xbf16>, vector<128x512xbf16>, vector<16x512xf32> -> vector<16x512xf32>
    %c0_61 = arith.constant 0 : index
    %c0_62 = arith.constant 0 : index
    %c0_63 = arith.constant 0 : index
    %183 = vector.load %arg11[%c0_61, %c0_62, %c0_63] : memref<1x1x512xf32, #tpu.memory_space<vmem>>, vector<1x1x512xf32>
    %184 = vector.shape_cast %183 : vector<1x1x512xf32> to vector<1x512xf32>
    %185 = vector.broadcast %184 : vector<1x512xf32> to vector<16x512xf32>
    %186 = arith.addf %182, %185 : vector<16x512xf32>
    %cst_64 = arith.constant 5.000000e-01 : f32
    %187 = vector.broadcast %cst_64 : f32 to vector<16x512xf32>
    %188 = arith.mulf %187, %186 : vector<16x512xf32>
    %cst_65 = arith.constant 0.707106769 : f32
    %189 = vector.broadcast %cst_65 : f32 to vector<16x512xf32>
    %190 = arith.mulf %186, %189 : vector<16x512xf32>
    %191 = math.erf %190 : vector<16x512xf32>
    %cst_66 = arith.constant 1.000000e+00 : f32
    %192 = vector.broadcast %cst_66 : f32 to vector<16x512xf32>
    %193 = arith.addf %192, %191 : vector<16x512xf32>
    %194 = arith.mulf %188, %193 : vector<16x512xf32>
    %195 = arith.truncf %194 : vector<16x512xf32> to vector<16x512xbf16>
    %c0_67 = arith.constant 0 : index
    %c0_68 = arith.constant 0 : index
    %c0_69 = arith.constant 0 : index
    %196 = vector.load %arg12[%c0_67, %c0_68, %c0_69] : memref<1x512x128xbf16, #tpu.memory_space<vmem>>, vector<1x512x128xbf16>
    %197 = vector.shape_cast %196 : vector<1x512x128xbf16> to vector<512x128xbf16>
    %cst_70 = arith.constant dense<0.000000e+00> : vector<16x128xf32>
    %198 = tpu.matmul %195, %197, %cst_70 {dimension_numbers = #tpu.dot_dimension_numbers<[1], [0], [0], [1], [0, 0, 1, 1], [], []>} : vector<16x512xbf16>, vector<512x128xbf16>, vector<16x128xf32> -> vector<16x128xf32>
    %c0_71 = arith.constant 0 : index
    %c0_72 = arith.constant 0 : index
    %c0_73 = arith.constant 0 : index
    %199 = vector.load %arg13[%c0_71, %c0_72, %c0_73] : memref<1x1x128xf32, #tpu.memory_space<vmem>>, vector<1x1x128xf32>
    %200 = vector.shape_cast %199 : vector<1x1x128xf32> to vector<1x128xf32>
    %201 = vector.broadcast %200 : vector<1x128xf32> to vector<16x128xf32>
    %202 = arith.addf %198, %201 : vector<16x128xf32>
    %203 = arith.addf %152, %202 : vector<16x128xf32>
    %c0_74 = arith.constant 0 : index
    %c0_75 = arith.constant 0 : index
    %204 = vector.load %arg16[%c0_74, %c0_75] : memref<16x128xf32, #tpu.memory_space<vmem>>, vector<16x128xf32>
    tpu.vector_store %arg16[%c0_74, %c0_75], %203 {strides = array<i32>} : memref<16x128xf32, #tpu.memory_space<vmem>>, vector<16x128xf32>,
    %c3_i32 = arith.constant 3 : i32
    %205 = arith.cmpi eq, %arg0, %c3_i32 : i32
    %206 = arith.extui %205 : i1 to i32
    %c0_i32_76 = arith.constant 0 : i32
    %207 = arith.cmpi ne, %206, %c0_i32_76 : i32
    scf.if %207 {
      %c0_77 = arith.constant 0 : index
      %c0_78 = arith.constant 0 : index
      %208 = vector.load %arg14[%c0_77, %c0_78] : memref<1x128xf32, #tpu.memory_space<vmem>>, vector<1x128xf32>
      %c0_79 = arith.constant 0 : index
      %c0_80 = arith.constant 0 : index
      %209 = vector.load %arg15[%c0_79, %c0_80] : memref<1x128xf32, #tpu.memory_space<vmem>>, vector<1x128xf32>
      %cst_81 = arith.constant dense<0.000000e+00> : vector<16xf32>
      %210 = vector.multi_reduction <add>, %203, %cst_81 [1] : vector<16x128xf32> to vector<16xf32>
      %211 = vector.shape_cast %210 : vector<16xf32> to vector<16x1xf32>
      %cst_82 = arith.constant 1.280000e+02 : f32
      %212 = vector.broadcast %cst_82 : f32 to vector<16x1xf32>
      %213 = arith.divf %211, %212 : vector<16x1xf32>
      %214 = vector.broadcast %213 : vector<16x1xf32> to vector<16x128xf32>
      %215 = arith.subf %203, %214 : vector<16x128xf32>
      %216 = arith.mulf %215, %215 : vector<16x128xf32>
      %cst_83 = arith.constant dense<0.000000e+00> : vector<16xf32>
      %217 = vector.multi_reduction <add>, %216, %cst_83 [1] : vector<16x128xf32> to vector<16xf32>
      %218 = vector.shape_cast %217 : vector<16xf32> to vector<16x1xf32>
      %cst_84 = arith.constant 1.280000e+02 : f32
      %219 = vector.broadcast %cst_84 : f32 to vector<16x1xf32>
      %220 = arith.divf %218, %219 : vector<16x1xf32>
      %221 = vector.broadcast %213 : vector<16x1xf32> to vector<16x128xf32>
      %222 = arith.subf %203, %221 : vector<16x128xf32>
      %cst_85 = arith.constant 9.99999974E-6 : f32
      %223 = vector.broadcast %cst_85 : f32 to vector<16x1xf32>
      %224 = arith.addf %220, %223 : vector<16x1xf32>
      %225 = math.rsqrt %224 : vector<16x1xf32>
      %226 = vector.broadcast %225 : vector<16x1xf32> to vector<16x128xf32>
      %227 = arith.mulf %222, %226 : vector<16x128xf32>
      %228 = vector.broadcast %208 : vector<1x128xf32> to vector<16x128xf32>
      %229 = arith.mulf %227, %228 : vector<16x128xf32>
      %230 = vector.broadcast %209 : vector<1x128xf32> to vector<16x128xf32>
      %231 = arith.addf %229, %230 : vector<16x128xf32>
      %c0_86 = arith.constant 0 : index
      %c0_87 = arith.constant 0 : index
      %232 = vector.load %arg16[%c0_86, %c0_87] : memref<16x128xf32, #tpu.memory_space<vmem>>, vector<16x128xf32>
      tpu.vector_store %arg16[%c0_86, %c0_87], %231 {strides = array<i32>} : memref<16x128xf32, #tpu.memory_space<vmem>>, vector<16x128xf32>,
    } else {
    }
    return
  }
  func.func @transform_0(%arg0: i32) -> (i32, i32) {
    %c0_i32 = arith.constant 0 : i32
    %c0_i32_0 = arith.constant 0 : i32
    %c0_i32_1 = arith.constant 0 : i32
    return %c0_i32, %c0_i32_0 : i32, i32
  }
  func.func @transform_1(%arg0: i32) -> (i32, i32, i32) {
    %c0_i32 = arith.constant 0 : i32
    %c0_i32_0 = arith.constant 0 : i32
    %c0_i32_1 = arith.constant 0 : i32
    return %arg0, %c0_i32, %c0_i32_0 : i32, i32, i32
  }
  func.func @transform_2(%arg0: i32) -> (i32, i32, i32) {
    %c0_i32 = arith.constant 0 : i32
    %c0_i32_0 = arith.constant 0 : i32
    %c0_i32_1 = arith.constant 0 : i32
    return %arg0, %c0_i32, %c0_i32_0 : i32, i32, i32
  }
  func.func @transform_3(%arg0: i32) -> (i32, i32, i32) {
    %c0_i32 = arith.constant 0 : i32
    %c0_i32_0 = arith.constant 0 : i32
    %c0_i32_1 = arith.constant 0 : i32
    return %arg0, %c0_i32, %c0_i32_0 : i32, i32, i32
  }
  func.func @transform_4(%arg0: i32) -> (i32, i32, i32) {
    %c0_i32 = arith.constant 0 : i32
    %c0_i32_0 = arith.constant 0 : i32
    %c0_i32_1 = arith.constant 0 : i32
    return %arg0, %c0_i32, %c0_i32_0 : i32, i32, i32
  }
  func.func @transform_5(%arg0: i32) -> (i32, i32, i32) {
    %c0_i32 = arith.constant 0 : i32
    %c0_i32_0 = arith.constant 0 : i32
    %c0_i32_1 = arith.constant 0 : i32
    return %arg0, %c0_i32, %c0_i32_0 : i32, i32, i32
  }
  func.func @transform_6(%arg0: i32) -> (i32, i32, i32) {
    %c0_i32 = arith.constant 0 : i32
    %c0_i32_0 = arith.constant 0 : i32
    %c0_i32_1 = arith.constant 0 : i32
    return %arg0, %c0_i32, %c0_i32_0 : i32, i32, i32
  }
  func.func @transform_7(%arg0: i32) -> (i32, i32, i32) {
    %c0_i32 = arith.constant 0 : i32
    %c0_i32_0 = arith.constant 0 : i32
    %c0_i32_1 = arith.constant 0 : i32
    return %arg0, %c0_i32, %c0_i32_0 : i32, i32, i32
  }
  func.func @transform_8(%arg0: i32) -> (i32, i32, i32) {
    %c0_i32 = arith.constant 0 : i32
    %c0_i32_0 = arith.constant 0 : i32
    %c0_i32_1 = arith.constant 0 : i32
    return %arg0, %c0_i32, %c0_i32_0 : i32, i32, i32
  }
  func.func @transform_9(%arg0: i32) -> (i32, i32, i32) {
    %c0_i32 = arith.constant 0 : i32
    %c0_i32_0 = arith.constant 0 : i32
    %c0_i32_1 = arith.constant 0 : i32
    return %arg0, %c0_i32, %c0_i32_0 : i32, i32, i32
  }
  func.func @transform_10(%arg0: i32) -> (i32, i32, i32) {
    %c0_i32 = arith.constant 0 : i32
    %c0_i32_0 = arith.constant 0 : i32
    %c0_i32_1 = arith.constant 0 : i32
    return %arg0, %c0_i32, %c0_i32_0 : i32, i32, i32
  }
  func.func @transform_11(%arg0: i32) -> (i32, i32, i32) {
    %c0_i32 = arith.constant 0 : i32
    %c0_i32_0 = arith.constant 0 : i32
    %c0_i32_1 = arith.constant 0 : i32
    return %arg0, %c0_i32, %c0_i32_0 : i32, i32, i32
  }
  func.func @transform_12(%arg0: i32) -> (i32, i32, i32) {
    %c0_i32 = arith.constant 0 : i32
    %c0_i32_0 = arith.constant 0 : i32
    %c0_i32_1 = arith.constant 0 : i32
    return %arg0, %c0_i32, %c0_i32_0 : i32, i32, i32
  }
  func.func @transform_13(%arg0: i32) -> (i32, i32) {
    %c0_i32 = arith.constant 0 : i32
    %c0_i32_0 = arith.constant 0 : i32
    %c0_i32_1 = arith.constant 0 : i32
    return %c0_i32, %c0_i32_0 : i32, i32
  }
  func.func @transform_14(%arg0: i32) -> (i32, i32) {
    %c0_i32 = arith.constant 0 : i32
    %c0_i32_0 = arith.constant 0 : i32
    %c0_i32_1 = arith.constant 0 : i32
    return %c0_i32, %c0_i32_0 : i32, i32
  }
  func.func @transform_15(%arg0: i32) -> (i32, i32) {
    %c0_i32 = arith.constant 0 : i32
    %c0_i32_0 = arith.constant 0 : i32
    %c0_i32_1 = arith.constant 0 : i32
    return %c0_i32, %c0_i32_0 : i32, i32
  }
}

</mosaic_0001>

<bundles_post_ra>
// kernel: tpu_custom_call.1
= control target key start
LH: loop header
LB: loop body
LE: loop exit
PB: predicated region body
PF: predicated region fallthrough
CT: control target
= control target key end

     0   :  { %s5480_s0 = inlined_call_operand.hbm [shape: f32[16,128], index: 0, kind: input, shape index: {}]   ;;  %s5481_s1 = inlined_call_operand.hbm [shape: f32[4,1,128], index: 1, kind: input, shape index: {}]   ;;  %s5482_s2 = inlined_call_operand.hbm [shape: f32[4,1,128], index: 2, kind: input, shape index: {}]   ;;  %s5483_s3 = inlined_call_operand.hbm [shape: bf16[4,128,384], index: 3, kind: input, shape index: {}]   ;;  %s5484_s4 = inlined_call_operand.hbm [shape: f32[4,1,384], index: 4, kind: input, shape index: {}]   ;;  %s5485_s5 = inlined_call_operand.hbm [shape: bf16[4,128,128], index: 5, kind: input, shape index: {}]   ;;  %s5486_s6 = inlined_call_operand.hbm [shape: f32[4,1,128], index: 6, kind: input, shape index: {}]   ;;  %s5487_s7 = inlined_call_operand.hbm [shape: f32[4,1,128], index: 7, kind: input, shape index: {}]   ;;  %s5488_s8 = inlined_call_operand.hbm [shape: f32[4,1,128], index: 8, kind: input, shape index: {}]   ;;  %s5489_s9 = inlined_call_operand.hbm [shape: bf16[4,128,512], index: 9, kind: input, shape index: {}]   ;;  %s5490_s10 = inlined_call_operand.vmem [shape: f32[4,1,512], index: 10, kind: input, shape index: {}]   ;;  %s5491_s11 = inlined_call_operand.hbm [shape: bf16[4,512,128], index: 11, kind: input, shape index: {}]   ;;  %s5492_s12 = inlined_call_operand.vmem [shape: f32[4,1,128], index: 12, kind: input, shape index: {}]   ;;  %s5493_s13 = inlined_call_operand.vmem [shape: f32[1,128], index: 13, kind: input, shape index: {}]   ;;  %s5494_s14 = inlined_call_operand.vmem [shape: f32[1,128], index: 14, kind: input, shape index: {}]   ;;  %s5495_s15 = inlined_call_operand.hbm [shape: f32[16,128], index: 15, kind: output, shape index: {}]  }
   0x1   :  { %5510 = sst [smem:[#allocation33_spill]] %s5480_s0 }
   0x2   :  { %5511 = sst [smem:[#allocation34_spill]] %s5481_s1 }
   0x3   :  { %5512 = sst [smem:[#allocation35_spill]] %s5483_s3 }
   0x4   :  { %5513 = sst [smem:[#allocation36_spill]] %s5485_s5 }
   0x5   :  { %5514 = sst [smem:[#allocation37_spill]] %s5487_s7 }
   0x6   :  { %5515 = sst [smem:[#allocation38_spill]] %s5489_s9 }
   0x7   :  { %5516 = sst [smem:[#allocation39_spill]] %s5490_s10 }
   0x8   :  { %5517 = sst [smem:[#allocation40_spill]] %s5492_s12 }
   0x9   :  { %5518 = sst [smem:[#allocation41_spill]] %s5493_s13 }
   0xa   :  { %5519 = sst [smem:[#allocation42_spill]] %s5494_s14 }
   0xb   :  { %5520 = sst [smem:[#allocation43_spill]] %s5495_s15 }
   0xc   :  { %20 = vsyncpa [#allocation4], 0 }
   0xd   :  { %21 = vsyncpa [#allocation7], 0 }
   0xe   :  { %23 = vsyncpa [#allocation7 + $0x1], 0 }
   0xf   :  { %24 = vsyncpa [#allocation10], 0 }
  0x10   :  { %26 = vsyncpa [#allocation10 + $0x1], 0 }
  0x11   :  { %27 = vsyncpa [#allocation13], 0 }
  0x12   :  { %29 = vsyncpa [#allocation13 + $0x1], 0 }
  0x13   :  { %30 = vsyncpa [#allocation16], 0 }
  0x14   :  { %32 = vsyncpa [#allocation16 + $0x1], 0 }
  0x15   :  { %33 = vsyncpa [#allocation19], 0 }
  0x16   :  { %35 = vsyncpa [#allocation19 + $0x1], 0 }
  0x17   :  { %36 = vsyncpa [#allocation5], 0  ;;  %s4667_s18 = smov 0   ;;  %s4669_s19 = smov 0  }
  0x18   :  { %s4671_s20 = smov 0   ;;  %s4673_s21 = smov 0  }
  0x19 LB: > { %5521 = sst [smem:[#allocation29_spill]] %s4552_s20  ;;  %s4688_s22 = sadd.s32 1, %s4556_s21   ;;  %s4556_s21 = sphi %s4673_s21, %s5558_s21   ;;  %s4552_s20 = sphi %s4671_s20, %s5560_s20   ;;  %s4548_s19 = sphi %s4669_s19, %s5562_s19   ;;  %s4544_s18 = sphi %s4667_s18, %s5561_s18  }
  0x1a   : > { %5522 = sst [smem:[#allocation30_spill]] %s4688_s22  ;;  %s70_s23 = sadd.s32 1, %s4552_s20 }
  0x1b   : > { %s67_s24 = ssub.s32 %s4556_s21, %s4688_s22  ;;  %p77_p0 = scmp.ne.s32.totalorder %s4552_s20, %s4548_s19 }
  0x1c   : > { %p68_p1 = scmp.eq.s32.totalorder %s67_s24, 0  ;;  %p78_p2 = scmp.eq.s32.totalorder %s4556_s21, 0 }
  0x1d   : > { %p3886_p3 = scmp.lt.s32.totalorder %s4556_s21, 4  ;;  %s4701_s26 = sand.u32 1, %s4556_s21  }
  0x1e   : > { %s4698_s25 = scalar_select %p68_p1, %s4552_s20, %s70_s23  }
  0x1f   : > { %p79_p4 = por %p78_p2, %p77_p0  ;;  %s4704_s27 = sand.u32 1, %s4552_s20  }
  0x20   : > { %5523 = sst [smem:[#allocation31_spill]] %s4698_s25  ;;  %s4707_s28 = sshll.u32 %s4556_s21, 4 }
  0x21   : > { %s5524_s1 = sld [smem:[#allocation34_spill]]  ;;  %s478_s17 = scalar_lea.vmem [#allocation6], %s4704_s27 }
  0x22   : > { %s485_s23 = sshll.u32 %s478_s17, 4  ;;  %p4718_p5 = pnand %p3886_p3, %p79_p4  ;;  %s4716_s23 = int_to_ptr.vmem [resolvable:$true] %s485_s23 }
  0x23   : > { %s3817_s20 = smul.u32 3072, %s4556_s21 }
  0x24   : > { %p4729_p7 = pneg %p4718_p5 }
  0x27   : > { %s4713_s16 = scalar_lea.hbm %s5524_s1, %s4707_s28  ;;  %s4173_s14 = scalar_lea.hbm %s5524_s1, 64 }
  0x28   : > { %s4168_s15 = scalar_lea.hbm %s4713_s16, 16  ;;  %p4174_p10 = scmp.lt.s32.totalorder %s4713_s16, %s5524_s1 }
  0x29   : > { %p4169_p6 = scmp.ne.s32.totalorder %s4713_s16, %s4168_s15  ;;  %p4175_p11 = scmp.lt.s32.totalorder %s4173_s14, %s4168_s15 }
  0x2b   : > { %p4171_p8 = pnand %p4729_p7, %p4169_p6  ;;  %p4176_p12 = por %p4175_p11, %p4174_p10 }
  0x2d   : > { %p4172_p9 = pneg %p4171_p8 }
  0x2f   : > { %p4177_p13 = pnand %p4176_p12, %p4172_p9 }
  0x31   : > { %4180 = shalt.err (!%p4177_p13)
}
  0x32   : > { %s4181_s25 = scalar_lea.vmem %s4716_s23, 16  ;;  %s4558_s22 = smov [#allocation6]  }
  0x33   : > { %p4182_p0 = scmp.ne.s32.totalorder %s4716_s23, %s4181_s25  ;;  %s4186_s30 = sshll.u32 %s4558_s22, 4  ;;  %s4187_s30 = int_to_ptr.vmem [resolvable:$false] %s4186_s30 }
  0x34   : > { %s4188_s17 = scalar_lea.vmem %s4187_s30, 32  ;;  %p4189_p3 = scmp.lt.s32.totalorder %s4716_s23, %s4187_s30 }
  0x35   : > { %p4184_p1 = pnand %p4182_p0, %p4729_p7  ;;  %p4190_p4 = scmp.lt.s32.totalorder %s4188_s17, %s4181_s25 }
  0x37   : > { %p4185_p2 = pneg %p4184_p1  ;;  %p4191_p6 = por %p4190_p4, %p4189_p3 }
  0x39   : > { %p4192_p8 = pnand %p4191_p6, %p4185_p2 }
  0x3b   : > { %4195 = shalt.err (!%p4192_p8)
}
  0x3c   : > { %s5527_s10 = scalar_lea.sflag [#allocation7], %s4701_s26  ;;  %s5528_s3 = sld [smem:[#allocation35_spill]] }
  0x3d   : > { %3857 = dma.hbm_to_vmem [thread:$0]  (!%p4718_p5), %s4713_s16, 16, %s4716_s23, %s5527_s10  }
  0x3e   : > { %s5529_s22 = smul.u32 192, %s4704_s27  ;;  %s5499_s17 = scalar_lea.sflag [#allocation10], %s4701_s26 }
  0x40   : > { %s513_s25 = scalar_lea.vmem [#allocation9], %s5529_s22 }
  0x41   : > { %s520_s30 = sshll.u32 %s513_s25, 4  ;;  %s4760_s30 = int_to_ptr.vmem [resolvable:$true] %s520_s30 }
  0x42   : > { %s4756_s15 = scalar_lea.hbm %s5528_s3, %s3817_s20  ;;  %s4201_s10 = scalar_lea.hbm %s5528_s3, 12288 }
  0x43   : > { %s4196_s1 = scalar_lea.hbm %s4756_s15, 3072  ;;  %p4202_p12 = scmp.lt.s32.totalorder %s4756_s15, %s5528_s3 }
  0x44   : > { %p4197_p9 = scmp.ne.s32.totalorder %s4756_s15, %s4196_s1  ;;  %p4203_p13 = scmp.lt.s32.totalorder %s4201_s10, %s4196_s1 }
  0x46   : > { %p4199_p10 = pnand %p4197_p9, %p4729_p7  ;;  %p4204_p0 = por %p4203_p13, %p4202_p12 }
  0x48   : > { %p4200_p11 = pneg %p4199_p10 }
  0x4a   : > { %p4205_p1 = pnand %p4204_p0, %p4200_p11 }
  0x4c   : > { %4208 = shalt.err (!%p4205_p1)
}
  0x4d   : > { %s4209_s14 = scalar_lea.vmem %s4760_s30, 3072  ;;  %s4559_s22 = smov [#allocation9]  }
  0x4e   : > { %p4210_p2 = scmp.ne.s32.totalorder %s4760_s30, %s4209_s14  ;;  %s4214_s25 = sshll.u32 %s4559_s22, 4  ;;  %s4215_s25 = int_to_ptr.vmem [resolvable:$false] %s4214_s25 }
  0x4f   : > { %s4216_s16 = scalar_lea.vmem %s4215_s25, 6144  ;;  %p4217_p6 = scmp.lt.s32.totalorder %s4760_s30, %s4215_s25 }
  0x50   : > { %p4212_p3 = pnand %p4210_p2, %p4729_p7  ;;  %p4218_p8 = scmp.lt.s32.totalorder %s4216_s16, %s4209_s14 }
  0x52   : > { %p4213_p4 = pneg %p4212_p3  ;;  %p4219_p9 = por %p4218_p8, %p4217_p6 }
  0x54   : > { %p4220_p10 = pnand %p4219_p9, %p4213_p4 }
  0x56   : > { %4223 = shalt.err (!%p4220_p10)
}
  0x57   : > { %s4560_s1 = smov 192   ;;  %s4561_s23 = smov 12  }
  0x58   : > { %3863 = dma.hbm_to_vmem [thread:$0]  (!%p4718_p5), %s4756_s15, 3072, %s4760_s30, %s5499_s17, %s4560_s1, %s4560_s1, %s4561_s23  }
  0x59   : > { %s3420_s10 = sshll.u32 %s4704_s27, 6  ;;  %s3568_s20 = sshll.u32 %s4556_s21, 10 }
  0x5a   : > { %s5530_s5 = sld [smem:[#allocation36_spill]]  ;;  %s553_s25 = scalar_lea.vmem [#allocation12], %s3420_s10 }
  0x5b   : > { %s560_s16 = sshll.u32 %s553_s25, 4  ;;  %s5502_s3 = scalar_lea.sflag [#allocation13], %s4701_s26  ;;  %s4792_s16 = int_to_ptr.vmem [resolvable:$true] %s560_s16 }
  0x60   : > { %s4790_s22 = scalar_lea.hbm %s5530_s5, %s3568_s20  ;;  %s4229_s1 = scalar_lea.hbm %s5530_s5, 4096 }
  0x61   : > { %s4224_s12 = scalar_lea.hbm %s4790_s22, 1024  ;;  %p4230_p0 = scmp.lt.s32.totalorder %s4790_s22, %s5530_s5 }
  0x62   : > { %p4225_p11 = scmp.ne.s32.totalorder %s4790_s22, %s4224_s12  ;;  %p4231_p1 = scmp.lt.s32.totalorder %s4229_s1, %s4224_s12 }
  0x64   : > { %p4227_p12 = pnand %p4225_p11, %p4729_p7  ;;  %p4232_p2 = por %p4231_p1, %p4230_p0 }
  0x66   : > { %p4228_p13 = pneg %p4227_p12 }
  0x68   : > { %p4233_p3 = pnand %p4232_p2, %p4228_p13 }
  0x6a   : > { %4236 = shalt.err (!%p4233_p3)
}
  0x6b   : > { %s4237_s10 = scalar_lea.vmem %s4792_s16, 1024  ;;  %s4562_s13 = smov [#allocation12]  }
  0x6c   : > { %p4238_p4 = scmp.ne.s32.totalorder %s4792_s16, %s4237_s10  ;;  %s4242_s14 = sshll.u32 %s4562_s13, 4  ;;  %s4243_s14 = int_to_ptr.vmem [resolvable:$false] %s4242_s14 }
  0x6d   : > { %s4244_s25 = scalar_lea.vmem %s4243_s14, 2048  ;;  %p4245_p9 = scmp.lt.s32.totalorder %s4792_s16, %s4243_s14 }
  0x6e   : > { %p4240_p6 = pnand %p4238_p4, %p4729_p7  ;;  %p4246_p10 = scmp.lt.s32.totalorder %s4244_s25, %s4237_s10 }
  0x70   : > { %p4241_p8 = pneg %p4240_p6  ;;  %p4247_p11 = por %p4246_p10, %p4245_p9 }
  0x72   : > { %p4248_p12 = pnand %p4247_p11, %p4241_p8 }
  0x74   : > { %4251 = shalt.err (!%p4248_p12)
}
  0x75   : > { %s5500_s12 = smov 64   ;;  %s5501_s15 = smov 4  }
  0x76   : > { %3869 = dma.hbm_to_vmem [thread:$0]  (!%p4718_p5), %s4790_s22, 1024, %s4792_s16, %s5502_s3, %s5500_s12, %s5500_s12, %s5501_s15  }
  0x77   : > { %s5531_s7 = sld [smem:[#allocation37_spill]]  ;;  %s590_s20 = scalar_lea.vmem [#allocation15], %s4704_s27 }
  0x78   : > { %s597_s10 = sshll.u32 %s590_s20, 4  ;;  %s3426_s13 = sshll.u32 %s4704_s27, 8  ;;  %s598_s10 = int_to_ptr.vmem [resolvable:$true] %s597_s10 }
  0x79   : > { %s5504_s14 = scalar_lea.sflag [#allocation16], %s4701_s26 }
  0x7d   : > { %s4824_s23 = scalar_lea.hbm %s5531_s7, %s4707_s28  ;;  %s4257_s16 = scalar_lea.hbm %s5531_s7, 64 }
  0x7e   : > { %s4252_s25 = scalar_lea.hbm %s4824_s23, 16  ;;  %p4258_p2 = scmp.lt.s32.totalorder %s4824_s23, %s5531_s7 }
  0x7f   : > { %p4253_p13 = scmp.ne.s32.totalorder %s4824_s23, %s4252_s25  ;;  %p4259_p3 = scmp.lt.s32.totalorder %s4257_s16, %s4252_s25 }
  0x81   : > { %p4255_p0 = pnand %p4253_p13, %p4729_p7  ;;  %p4260_p4 = por %p4259_p3, %p4258_p2 }
  0x83   : > { %p4256_p1 = pneg %p4255_p0 }
  0x85   : > { %p4261_p6 = pnand %p4260_p4, %p4256_p1 }
  0x87   : > { %4264 = shalt.err (!%p4261_p6)
}
  0x88   : > { %s4265_s20 = scalar_lea.vmem %s598_s10, 16  ;;  %s4565_s12 = smov [#allocation15]  }
  0x89   : > { %p4266_p8 = scmp.ne.s32.totalorder %s598_s10, %s4265_s20  ;;  %s4270_s15 = sshll.u32 %s4565_s12, 4  ;;  %s4271_s15 = int_to_ptr.vmem [resolvable:$false] %s4270_s15 }
  0x8a   : > { %s4272_s3 = scalar_lea.vmem %s4271_s15, 32  ;;  %p4273_p11 = scmp.lt.s32.totalorder %s598_s10, %s4271_s15 }
  0x8b   : > { %p4268_p9 = pnand %p4266_p8, %p4729_p7  ;;  %p4274_p12 = scmp.lt.s32.totalorder %s4272_s3, %s4265_s20 }
  0x8d   : > { %p4269_p10 = pneg %p4268_p9  ;;  %p4275_p13 = por %p4274_p12, %p4273_p11 }
  0x8f   : > { %p4276_p0 = pnand %p4275_p13, %p4269_p10 }
  0x91   : > { %4279 = shalt.err (!%p4276_p0)
}
  0x92   : > { %3875 = dma.hbm_to_vmem [thread:$0]  (!%p4718_p5), %s4824_s23, 16, %s598_s10, %s5504_s14  }
  0x93   : > { %s3569_s17 = sshll.u32 %s4556_s21, 12  ;;  %s5532_s9 = sld [smem:[#allocation38_spill]] }
  0x94   : > { %s625_s15 = scalar_lea.vmem [#allocation18], %s3426_s13  ;;  %s5503_s16 = scalar_lea.sflag [#allocation19], %s4701_s26 }
  0x95   : > { %s632_s22 = sshll.u32 %s625_s15, 4  ;;  %s4857_s22 = int_to_ptr.vmem [resolvable:$true] %s632_s22 }
  0x99   : > { %s4853_s3 = scalar_lea.hbm %s5532_s9, %s3569_s17  ;;  %s4285_s1 = scalar_lea.hbm %s5532_s9, 16384 }
  0x9a   : > { %s4280_s30 = scalar_lea.hbm %s4853_s3, 4096  ;;  %p4286_p4 = scmp.lt.s32.totalorder %s4853_s3, %s5532_s9 }
  0x9b   : > { %p4281_p1 = scmp.ne.s32.totalorder %s4853_s3, %s4280_s30  ;;  %p4287_p6 = scmp.lt.s32.totalorder %s4285_s1, %s4280_s30 }
  0x9d   : > { %p4283_p2 = pnand %p4281_p1, %p4729_p7  ;;  %p4288_p8 = por %p4287_p6, %p4286_p4 }
  0x9f   : > { %p4284_p3 = pneg %p4283_p2 }
  0xa1   : > { %p4289_p9 = pnand %p4288_p8, %p4284_p3 }
  0xa3   : > { %4292 = shalt.err (!%p4289_p9)
}
  0xa4   : > { %s4293_s25 = scalar_lea.vmem %s4857_s22, 4096  ;;  %s4566_s15 = smov [#allocation18]  }
  0xa5   : > { %p4294_p10 = scmp.ne.s32.totalorder %s4857_s22, %s4293_s25  ;;  %s4298_s23 = sshll.u32 %s4566_s15, 4  ;;  %s4299_s23 = int_to_ptr.vmem [resolvable:$false] %s4298_s23 }
  0xa6   : > { %s4300_s10 = scalar_lea.vmem %s4299_s23, 8192  ;;  %p4301_p13 = scmp.lt.s32.totalorder %s4857_s22, %s4299_s23 }
  0xa7   : > { %p4296_p11 = pnand %p4294_p10, %p4729_p7  ;;  %p4302_p0 = scmp.lt.s32.totalorder %s4300_s10, %s4293_s25 }
  0xa9   : > { %p4297_p12 = pneg %p4296_p11  ;;  %p4303_p1 = por %p4302_p0, %p4301_p13 }
  0xab   : > { %p4304_p2 = pnand %p4303_p1, %p4297_p12 }
  0xad   : > { %4307 = shalt.err (!%p4304_p2)
}
  0xae   : > { %s4567_s30 = smov 256   ;;  %s4568_s1 = smov 16  }
  0xaf   : > { %3881 = dma.hbm_to_vmem [thread:$0]  (!%p4718_p5), %s4853_s3, 4096, %s4857_s22, %s5503_s16, %s4567_s30, %s4567_s30, %s4568_s1  }
  0xb0   : > { %s4887_s25 = scalar_lea.hbm %s5491_s11, %s3569_s17  ;;  %s653_s15 = scalar_lea.vmem [#allocation20], %s3426_s13 }
  0xb1   : > { %s660_s23 = sshll.u32 %s653_s15, 4  ;;  %s4894_s10 = sadd.s32 4294967295, %s4556_s21   ;;  %s4891_s23 = int_to_ptr.vmem [resolvable:$true] %s660_s23 }
  0xb2   : > { %p83_p3 = scmp.ne.s32.totalorder %s4548_s19, %s4544_s18  ;;  %p5507_p4 = scmp.eq.s32.totalorder %s4894_s10, 0 }
  0xb3   : > { %p3413_p6 = scmp.ge.s32.totalorder %s4556_s21, 1  ;;  %p443_p8 = scmp.lt.s32.totalorder %s4556_s21, 5 }
  0xb4   : > { %p4903_p9 = por %p5507_p4, %p83_p3  ;;  %s4569_s3 = smov [#allocation3]  }
  0xb5   : > { %p4908_p11 = pnand %p3413_p6, %p443_p8  ;;  %s455_s22 = sshll.u32 %s4569_s3, 4  ;;  %s456_s22 = int_to_ptr.vmem [resolvable:$true] %s455_s22 }
  0xb6   : > { %s5533_s17 = scalar_select %p4903_p9, 1, 0 }
  0xb7   : > { %s5535_s13 = scalar_select %p4908_p11, 1, 0 }
  0xb8   : > { %5534 = sst [smem:[#allocation32_spill]] %s5533_s17  ;;  %p3850_p12 = pneg %p4908_p11 }
  0xb9   : > { %s4924_s20 = scalar_lea.hbm %s5482_s2, %s4707_s28  ;;  %s495_s12 = scalar_lea.vmem [#allocation8], %s4704_s27 }
  0xba   : > { %p4916_p13 = pnand %p3850_p12, %p5507_p4  ;;  %s502_s15 = sshll.u32 %s495_s12, 4  ;;  %s4928_s15 = int_to_ptr.vmem [resolvable:$true] %s502_s15 }
  0xbb   : > { %s4319_s3 = scalar_lea.vmem %s456_s22, 256  ;;  %p4327_p6 = scmp.lt.s32.totalorder %s456_s22, %s456_s22 }
  0xbc   : > { %p4310_p0 = pneg %p4916_p13  ;;  %p4320_p1 = scmp.ne.s32.totalorder %s456_s22, %s4319_s3 }
  0xbd   : > { %p4328_p8 = scmp.lt.s32.totalorder %s4319_s3, %s4319_s3 }
  0xbe   : > { %p4322_p2 = pnand %p4320_p1, %p4310_p0 }
  0xbf   : > { %p4329_p12 = por %p4328_p8, %p4327_p6 }
  0xc0   : > { %p4323_p3 = pneg %p4322_p2 }
  0xc2   : > { %p4330_p10 = pnand %p4329_p12, %p4323_p3 }
  0xc4   : > { %4333 = shalt.err (!%p4330_p10)
}
  0xc5   : > { %s4570_s30 = smov 128   ;;  %s4571_s1 = smov 8  }
  0xc6   : > { %s5537_s0 = sld [smem:[#allocation33_spill]]  ;;  %s4334_s16 = scalar_lea.hbm %s4924_s20, 16 }
  0xc7   : > { %p4335_p0 = scmp.ne.s32.totalorder %s4924_s20, %s4334_s16  ;;  %s4339_s7 = scalar_lea.hbm %s5482_s2, 64 }
  0xc8   : > { %p4340_p10 = scmp.lt.s32.totalorder %s4924_s20, %s5482_s2  ;;  %p4341_p3 = scmp.lt.s32.totalorder %s4339_s7, %s4334_s16 }
  0xc9   : > { %p4337_p1 = pnand %p4335_p0, %p4729_p7 }
  0xca   : > { %p4342_p6 = por %p4341_p3, %p4340_p10 }
  0xcb   : > { %p4338_p2 = pneg %p4337_p1 }
  0xcc   : > { %3853 = dma.hbm_to_vmem [thread:$0]  (!%p4916_p13), %s5537_s0, 256, %s456_s22, [#allocation4], %s4570_s30, %s4570_s30, %s4571_s1  }
  0xcd   : > { %p4343_p8 = pnand %p4342_p6, %p4338_p2 }
  0xcf   : > { %4346 = shalt.err (!%p4343_p8)
}
  0xd0   : > { %s4347_s14 = scalar_lea.vmem %s4928_s15, 16  ;;  %s4572_s22 = smov [#allocation8]  }
  0xd1   : > { %p4348_p13 = scmp.ne.s32.totalorder %s4928_s15, %s4347_s14  ;;  %s4352_s5 = sshll.u32 %s4572_s22, 4  ;;  %s4353_s5 = int_to_ptr.vmem [resolvable:$false] %s4352_s5 }
  0xd2   : > { %s4354_s18 = scalar_lea.vmem %s4353_s5, 32  ;;  %p4355_p1 = scmp.lt.s32.totalorder %s4928_s15, %s4353_s5 }
  0xd3   : > { %p4350_p12 = pnand %p4348_p13, %p4729_p7  ;;  %p4356_p4 = scmp.lt.s32.totalorder %s4354_s18, %s4347_s14 }
  0xd5   : > { %p4351_p0 = pneg %p4350_p12  ;;  %p4357_p9 = por %p4356_p4, %p4355_p1 }
  0xd7   : > { %p4358_p11 = pnand %p4357_p9, %p4351_p0 }
  0xd9   : > { %4361 = shalt.err (!%p4358_p11)
}
  0xda   : > { %s5538_s7 = scalar_lea.sflag [#allocation7], %s4701_s26  ;;  %s3819_s9 = smul.u32 48, %s4556_s21 }
  0xdb   : > { %3860 = dma.hbm_to_vmem [thread:$0]  (!%p4718_p5), %s4924_s20, 16, %s4928_s15, %s5538_s7  }
  0xdc   : > { %s5539_s16 = smul.u32 3, %s4704_s27  ;;  %s540_s3 = scalar_lea.hbm %s5484_s4, %s3819_s9 }
  0xdd   : > { %s4362_s14 = scalar_lea.hbm %s540_s3, 48  ;;  %s4367_s18 = scalar_lea.hbm %s5484_s4, 192 }
  0xde   : > { %s534_s17 = scalar_lea.vmem [#allocation11], %s5539_s16  ;;  %p4363_p4 = scmp.ne.s32.totalorder %s540_s3, %s4362_s14 }
  0xdf   : > { %s542_s30 = sshll.u32 %s534_s17, 4  ;;  %p4368_p2 = scmp.lt.s32.totalorder %s540_s3, %s5484_s4  ;;  %s543_s30 = int_to_ptr.vmem [resolvable:$true] %s542_s30 }
  0xe0   : > { %p4365_p9 = pnand %p4363_p4, %p4729_p7  ;;  %p4369_p10 = scmp.lt.s32.totalorder %s4367_s18, %s4362_s14 }
  0xe2   : > { %p4366_p11 = pneg %p4365_p9  ;;  %p4370_p3 = por %p4369_p10, %p4368_p2 }
  0xe4   : > { %p4371_p6 = pnand %p4370_p3, %p4366_p11 }
  0xe6   : > { %4374 = shalt.err (!%p4371_p6)
}
  0xe7   : > { %s4375_s21 = scalar_lea.vmem %s543_s30, 48  ;;  %s4573_s15 = smov [#allocation11]  }
  0xe8   : > { %p4376_p8 = scmp.ne.s32.totalorder %s543_s30, %s4375_s21  ;;  %s4380_s7 = sshll.u32 %s4573_s15, 4  ;;  %s4381_s7 = int_to_ptr.vmem [resolvable:$false] %s4380_s7 }
  0xe9   : > { %s4382_s9 = scalar_lea.vmem %s4381_s7, 96  ;;  %p4383_p0 = scmp.lt.s32.totalorder %s543_s30, %s4381_s7 }
  0xea   : > { %p4378_p13 = pnand %p4376_p8, %p4729_p7  ;;  %p4384_p1 = scmp.lt.s32.totalorder %s4382_s9, %s4375_s21 }
  0xec   : > { %p4379_p12 = pneg %p4378_p13  ;;  %p4385_p4 = por %p4384_p1, %p4383_p0 }
  0xee   : > { %p4386_p9 = pnand %p4385_p4, %p4379_p12 }
  0xf0   : > { %4389 = shalt.err (!%p4386_p9)
}
  0xf1   : > { %s5540_s0 = scalar_lea.sflag [#allocation10], %s4701_s26  ;;  %s578_s1 = scalar_lea.hbm %s5486_s6, %s4707_s28 }
  0xf2   : > { %3866 = dma.hbm_to_vmem [thread:$0]  (!%p4718_p5), %s540_s3, 48, %s543_s30, %s5540_s0  }
  0xf3   : > { %s573_s12 = scalar_lea.vmem [#allocation14], %s4704_s27  ;;  %s4390_s22 = scalar_lea.hbm %s578_s1, 16 }
  0xf4   : > { %s580_s14 = sshll.u32 %s573_s12, 4  ;;  %p4391_p11 = scmp.ne.s32.totalorder %s578_s1, %s4390_s22  ;;  %s581_s14 = int_to_ptr.vmem [resolvable:$true] %s580_s14 }
  0xf5   : > { %s4395_s20 = scalar_lea.hbm %s5486_s6, 64  ;;  %p4396_p3 = scmp.lt.s32.totalorder %s578_s1, %s5486_s6 }
  0xf6   : > { %p4393_p2 = pnand %p4391_p11, %p4729_p7  ;;  %p4397_p6 = scmp.lt.s32.totalorder %s4395_s20, %s4390_s22 }
  0xf8   : > { %p4394_p10 = pneg %p4393_p2  ;;  %p4398_p8 = por %p4397_p6, %p4396_p3 }
  0xfa   : > { %p4399_p13 = pnand %p4398_p8, %p4394_p10 }
  0xfc   : > { %4402 = shalt.err (!%p4399_p13)
}
  0xfd   : > { %s4403_s30 = scalar_lea.vmem %s581_s14, 16  ;;  %s4574_s3 = smov [#allocation14]  }
  0xfe   : > { %p4404_p12 = scmp.ne.s32.totalorder %s581_s14, %s4403_s30  ;;  %s4408_s7 = sshll.u32 %s4574_s3, 4  ;;  %s4409_s7 = int_to_ptr.vmem [resolvable:$false] %s4408_s7 }
  0xff   : > { %s4410_s9 = scalar_lea.vmem %s4409_s7, 32  ;;  %p4411_p4 = scmp.lt.s32.totalorder %s581_s14, %s4409_s7 }
 0x100   : > { %p4406_p0 = pnand %p4404_p12, %p4729_p7  ;;  %p4412_p9 = scmp.lt.s32.totalorder %s4410_s9, %s4403_s30 }
 0x102   : > { %p4407_p1 = pneg %p4406_p0  ;;  %p4413_p11 = por %p4412_p9, %p4411_p4 }
 0x104   : > { %p4414_p2 = pnand %p4413_p11, %p4407_p1 }
 0x106   : > { %4417 = shalt.err (!%p4414_p2)
}
 0x107   : > { %s5541_s0 = scalar_lea.sflag [#allocation13], %s4701_s26  ;;  %s612_s12 = scalar_lea.hbm %s5488_s8, %s4707_s28 }
 0x108   : > { %3872 = dma.hbm_to_vmem [thread:$0]  (!%p4718_p5), %s578_s1, 16, %s581_s14, %s5541_s0  }
 0x109   : > { %s607_s22 = scalar_lea.vmem [#allocation17], %s4704_s27  ;;  %s4418_s18 = scalar_lea.hbm %s612_s12, 16 }
 0x10a   : > { %s614_s5 = sshll.u32 %s607_s22, 4  ;;  %p4419_p10 = scmp.ne.s32.totalorder %s612_s12, %s4418_s18  ;;  %s615_s5 = int_to_ptr.vmem [resolvable:$true] %s614_s5 }
 0x10b   : > { %s4423_s15 = scalar_lea.hbm %s5488_s8, 64  ;;  %p4424_p8 = scmp.lt.s32.totalorder %s612_s12, %s5488_s8 }
 0x10c   : > { %p4421_p3 = pnand %p4419_p10, %p4729_p7  ;;  %p4425_p13 = scmp.lt.s32.totalorder %s4423_s15, %s4418_s18 }
 0x10e   : > { %p4422_p6 = pneg %p4421_p3  ;;  %p4426_p12 = por %p4425_p13, %p4424_p8 }
 0x110   : > { %p4427_p0 = pnand %p4426_p12, %p4422_p6 }
 0x112   : > { %4430 = shalt.err (!%p4427_p0)
}
 0x113   : > { %s4431_s27 = scalar_lea.vmem %s615_s5, 16  ;;  %s4575_s28 = smov [#allocation17]  }
 0x114   : > { %p4432_p1 = scmp.ne.s32.totalorder %s615_s5, %s4431_s27  ;;  %s4436_s1 = sshll.u32 %s4575_s28, 4  ;;  %s4437_s1 = int_to_ptr.vmem [resolvable:$false] %s4436_s1 }
 0x115   : > { %s4438_s14 = scalar_lea.vmem %s4437_s1, 32  ;;  %p4439_p11 = scmp.lt.s32.totalorder %s615_s5, %s4437_s1 }
 0x116   : > { %p4434_p4 = pnand %p4432_p1, %p4729_p7  ;;  %p4440_p2 = scmp.lt.s32.totalorder %s4438_s14, %s4431_s27 }
 0x118   : > { %p4435_p9 = pneg %p4434_p4  ;;  %p4441_p10 = por %p4440_p2, %p4439_p11 }
 0x11a   : > { %p4442_p3 = pnand %p4441_p10, %p4435_p9 }
 0x11c   : > { %4445 = shalt.err (!%p4442_p3)
}
 0x11d   : > { %s5542_s7 = scalar_lea.sflag [#allocation16], %s4701_s26  ;;  %s4446_s9 = scalar_lea.hbm %s4887_s25, 4096 }
 0x11e   : > { %3878 = dma.hbm_to_vmem [thread:$0]  (!%p4718_p5), %s612_s12, 16, %s615_s5, %s5542_s7  }
 0x11f   : > { %p4447_p6 = scmp.ne.s32.totalorder %s4887_s25, %s4446_s9  ;;  %s4451_s17 = scalar_lea.hbm %s5491_s11, 16384 }
 0x120   : > { %p4452_p12 = scmp.lt.s32.totalorder %s4887_s25, %s5491_s11  ;;  %p4453_p0 = scmp.lt.s32.totalorder %s4451_s17, %s4446_s9 }
 0x121   : > { %p4449_p8 = pnand %p4447_p6, %p4729_p7 }
 0x122   : > { %p4454_p1 = por %p4453_p0, %p4452_p12 }
 0x123   : > { %p4450_p13 = pneg %p4449_p8 }
 0x125   : > { %p4455_p4 = pnand %p4454_p1, %p4450_p13 }
 0x127   : > { %4458 = shalt.err (!%p4455_p4)
}
 0x128   : > { %s4459_s12 = scalar_lea.vmem %s4891_s23, 4096  ;;  %s4576_s5 = smov [#allocation20]  }
 0x129   : > { %p4460_p9 = scmp.ne.s32.totalorder %s4891_s23, %s4459_s12  ;;  %s4464_s20 = sshll.u32 %s4576_s5, 4  ;;  %s4465_s20 = int_to_ptr.vmem [resolvable:$false] %s4464_s20 }
 0x12a   : > { %s4466_s21 = scalar_lea.vmem %s4465_s20, 8192  ;;  %p4467_p10 = scmp.lt.s32.totalorder %s4891_s23, %s4465_s20 }
 0x12b   : > { %p4462_p11 = pnand %p4460_p9, %p4729_p7  ;;  %p4468_p3 = scmp.lt.s32.totalorder %s4466_s21, %s4459_s12 }
 0x12d   : > { %p4463_p2 = pneg %p4462_p11  ;;  %p4469_p6 = por %p4468_p3, %p4467_p10 }
 0x12f   : > { %p4470_p8 = pnand %p4469_p6, %p4463_p2 }
 0x131   : > { %4473 = shalt.err (!%p4470_p8)
}
 0x132   : > { %s5543_s15 = smov 4   ;;  %s5544_s30 = smov 64  }
 0x133   : > { %s5545_s3 = scalar_lea.sflag [#allocation19], %s4701_s26  ;;  %p5546_p7 = scmp.ne.s32.totalorder %s5535_s13, 0 }
 0x134   : > { %3884 = dma.hbm_to_vmem [thread:$0]  (!%p4718_p5), %s4887_s25, 4096, %s4891_s23, %s5545_s3, %s5544_s30, %s5544_s30, %s5543_s15  }
 0x135   : > { %678 = sbr.rel (%p5546_p7) target bundleno = 3041 (0xbe1), region = 80  ;;  %p5547_p13 = scmp.eq.s32.totalorder (!%p5546_p7), %s4894_s10, 0 }
 0x13a   : > { %4515 = dma.done.wait (%p5547_p13), [#allocation4], 256   ;;  %p5548_p12 = pmov %p5547_p13 }
 0x13b   : > { %s5549_s24 = sld [smem:[#allocation32_spill]]  ;;  %s5049_s29 = sand.u32 1, %s4894_s10  }
 0x13c   : > { %4517 = vsyncadd (%p5548_p12), [#allocation4], 4294967040  ;;  %s5052_s27 = sand.u32 1, %s4548_s19   ;;  %s685_s26 = scalar_lea.sflag [#allocation7], %s5049_s29 }
 0x13d   : > { %s687_s25 = scalar_lea.vmem [#allocation6], %s5052_s27 }
 0x141   : > { %p5550_p5 = scmp.ne.s32.totalorder %s5549_s24, 0 }
 0x143   : > { %4519 = dma.done.wait (%p5550_p5), %s685_s26, 32  }
 0x144   : > { %4521 = vsyncadd (%p5550_p5), %s685_s26, 4294967264  ;;  %s3820_s23 = smul.u32 192, %s5052_s27  ;;  %s695_s13 = scalar_lea.vmem [#allocation8], %s5052_s27 }
 0x145   : > { %s701_s28 = scalar_lea.sflag [#allocation10], %s5049_s29 }
 0x146   : > { %s5063_s1 = scalar_lea.vmem [#allocation9], %s3820_s23 }
 0x147   : > { %4523 = dma.done.wait (%p5550_p5), %s701_s28, 3120  }
 0x148   : > { %4525 = vsyncadd (%p5550_p5), %s701_s28, 4294964176  ;;  %s3821_s14 = smul.u32 3, %s5052_s27  ;;  %s3434_s7 = sshll.u32 %s5052_s27, 6 }
 0x149   : > { %s719_s0 = scalar_lea.sflag [#allocation13], %s5049_s29  ;;  %s5074_s16 = scalar_lea.vmem [#allocation12], %s3434_s7 }
 0x14a   : > { %s5071_s9 = scalar_lea.vmem [#allocation11], %s3821_s14 }
 0x14b   : > { %4527 = dma.done.wait (%p5550_p5), %s719_s0, 1040  }
 0x14c   : > { %4529 = vsyncadd (%p5550_p5), %s719_s0, 4294966256  ;;  %s730_s17 = scalar_lea.vmem [#allocation14], %s5052_s27  ;;  %s736_s22 = scalar_lea.sflag [#allocation16], %s5049_s29 }
 0x14d   : > { %s738_s18 = scalar_lea.vmem [#allocation15], %s5052_s27 }
 0x14e   : > { %4531 = dma.done.wait (%p5550_p5), %s736_s22, 32  }
 0x14f   : > { %4533 = vsyncadd (%p5550_p5), %s736_s22, 4294967264  ;;  %s3435_s12 = sshll.u32 %s5052_s27, 8  ;;  %s746_s5 = scalar_lea.vmem [#allocation17], %s5052_s27 }
 0x150   : > { %s752_s20 = scalar_lea.sflag [#allocation19], %s5049_s29  ;;  %s5090_s21 = scalar_lea.vmem [#allocation18], %s3435_s12 }
 0x151   : > { %4535 = dma.done.wait (%p5550_p5), %s752_s20, 8192  }
 0x152   : > { %4537 = vsyncadd (%p5550_p5), %s752_s20, 4294959104  ;;  %p853_p0 = scmp.lt.s32.totalorder %s4894_s10, 3  ;;  %s5551_s23 = sld [smem:[#allocation40_spill]] }
 0x153   : > { %s5552_s7 = sld [smem:[#allocation39_spill]]  ;;  %s5110_s22 = scalar_lea.vmem [#allocation20], %s3435_s12 }
 0x154   : > { %s5098_s15 = scalar_select %p853_p0, %s4894_s10, 3 }
 0x155   : > { %p5553_p1 = scmp.ne.s32.totalorder %s4894_s10, 0 }
 0x156   : > { %s3437_s30 = sshll.u32 %s5098_s15, 2 }
 0x157   : > { %864 = sbr.rel (%p5553_p1) target bundleno = 355 (0x163), region = 128 }
 0x158   : > { %s859_s28 = scalar_lea.vmem %s5551_s23, %s5098_s15 }
 0x159   : > { %s5108_s0 = scalar_lea.vmem %s5552_s7, %s3437_s30 }
 0x15c   : > { %v865_v0 = vld [vmem:[#allocation3] sm:$0xff]  ;;  %v866_v1 = vld [vmem:[#allocation3 + $0x8] sm:$0xff]  ;;  %v869_v2 = vlaneseq  ;;  %vm875_vm0 = vcmask 64512   ;;  %v4577_v5 = vmov -inf  }
 0x15d   : > { %867 = vst [vmem:[#allocation21] sm:$0xff] %v865_v0  ;;  %868 = vst [vmem:[#allocation21 + $0x8] sm:$0xff] %v866_v1 }
 0x15e   : > { %v870_v3 = vshrl.u32 %v869_v2, 7  ;;  %v872_v4 = vand.u32 127, %v869_v2 }
 0x160   : > { %vm873_vm1 = vcmp.ge.s32.totalorder %v870_v3, %v872_v4 }
 0x161   : > { %v874_v6 = vsel %vm873_vm1, 0.0, %v4577_v5 }
 0x162   : > { %876 = vst.msk [vmem:[#allocation2] sm:$0xff] %vm875_vm0, %v874_v6 }
 0x163 PF: > { %v3986_v9 = vld [vmem:[%s5063_s1 + $0xac] ss:$12 sps:$4 sm:$0xff]   ;;  %v3988_v10 = vld [vmem:[%s5063_s1 + $0xa8] ss:$12 sps:$4 sm:$0xff]   ;;  %v4578_v11 = vmov 0.0   ;;  %v4579_v34 = vmov 0   ;;  %v955_v60 = vlaneseq }
 0x164   : > { %v877_v7 = vld [vmem:[#allocation21] sm:$0xff]  ;;  %v878_v8 = vld [vmem:[#allocation21 + $0x8] sm:$0xff]  ;;  %3668 = vmatprep.subr.bf16.mxu1 %v4578_v11  ;;  %1098 = vmatprep.subr.bf16.mxu0 %v3986_v9  ;;  %v3994_v24 = vld [vmem:[%s5063_s1 + $0x7c] ss:$12 sps:$4 sm:$0xff]   ;;  %vm4580_vm2 = vmmov 0   ;;  %vm1269_vm3 = vcmask 261120  }
 0x165   : > { %881 = vadd.xlane.f32.xlu0 %v877_v7  ;;  %v3989_v12 = vld [vmem:[%s5063_s1 + $0xb0] ss:$12 sps:$4 sm:$0xff]   ;;  %1099 = vmatpush1.bf16.msra.mxu0 %v3988_v10  ;;  %v3990_v21 = vld [vmem:[%s5063_s1 + $0x94] ss:$12 sps:$4 sm:$0xff]   ;;  %v3993_v23 = vld [vmem:[%s5063_s1 + $0x98] ss:$12 sps:$4 sm:$0xff]  }
 0x166   : > { %3669 = vmatpush3.bf16.msra.mxu1 %v3989_v12  ;;  %v3992_v22 = vld [vmem:[%s5063_s1 + $0x90] ss:$12 sps:$4 sm:$0xff]   ;;  %1100 = vmatprep.subr.bf16.mxu0 %v3990_v21  ;;  %v3996_v25 = vld [vmem:[%s5063_s1 + $0x78] ss:$12 sps:$4 sm:$0xff]   ;;  %v3997_v26 = vld [vmem:[%s5063_s1 + $0x80] ss:$12 sps:$4 sm:$0xff]  }
 0x167   : > { %3670 = vmatprep.subr.bf16.mxu1 %v4578_v11  ;;  %v3998_v27 = vld [vmem:[%s5063_s1 + $0x64] ss:$12 sps:$4 sm:$0xff]   ;;  %v4000_v28 = vld [vmem:[%s5063_s1 + $0x60] ss:$12 sps:$4 sm:$0xff]   ;;  %v4001_v29 = vld [vmem:[%s5063_s1 + $0x68] ss:$12 sps:$4 sm:$0xff]   ;;  %1130 = vmatprep.mubr.bf16.mxu0 %v4579_v34 }
 0x168   : > { %v4002_v30 = vld [vmem:[%s5063_s1 + $0x4c] ss:$12 sps:$4 sm:$0xff]   ;;  %v4004_v31 = vld [vmem:[%s5063_s1 + $0x48] ss:$12 sps:$4 sm:$0xff]   ;;  %v4005_v32 = vld [vmem:[%s5063_s1 + $0x50] ss:$12 sps:$4 sm:$0xff]   ;;  %3684 = vmatprep.mubr.msk.bf16.mxu1 %vm4580_vm2, %v4578_v11 }
 0x169   : > { %883 = vadd.xlane.f32.xlu0 %v878_v8  ;;  %1101 = vmatpush1.bf16.msra.mxu0 %v3992_v22  ;;  %v4006_v33 = vld [vmem:[%s5063_s1 + $0x34] ss:$12 sps:$4 sm:$0xff]   ;;  %v4008_v35 = vld [vmem:[%s5063_s1 + $0x30] ss:$12 sps:$4 sm:$0xff]   ;;  %v4009_v36 = vld [vmem:[%s5063_s1 + $0x38] ss:$12 sps:$4 sm:$0xff]  }
 0x16a   : > { %3671 = vmatpush3.bf16.msra.mxu1 %v3993_v23  ;;  %1102 = vmatprep.subr.bf16.mxu0 %v3994_v24  ;;  %v4010_v37 = vld [vmem:[%s5063_s1 + $0x1c] ss:$12 sps:$4 sm:$0xff]   ;;  %v4012_v38 = vld [vmem:[%s5063_s1 + $0x18] ss:$12 sps:$4 sm:$0xff]   ;;  %v4013_v39 = vld [vmem:[%s5063_s1 + $0x20] ss:$12 sps:$4 sm:$0xff]  }
 0x16b   : > { %3672 = vmatprep.subr.bf16.mxu1 %v4578_v11  ;;  %v4014_v40 = vld [vmem:[%s5063_s1 + $0x4] ss:$12 sps:$4 sm:$0xff]   ;;  %v4016_v41 = vld [vmem:[%s5063_s1] ss:$12 sps:$4 sm:$0xff]   ;;  %v4017_v42 = vld [vmem:[%s5063_s1 + $0x8] ss:$12 sps:$4 sm:$0xff]  }
 0x16c   : > { %v3439_v51 = vld [vmem:[%s687_s25] ss:$0 sm:$0xff]  ;;  %v5169_v61 = vshrl.u32 %v955_v60, 7  ;;  %s4581_s24 = smov 96   ;;  %s4582_s25 = smov 32   ;;  %vm1738_vm4 = vcmask 1043456  }
 0x16d   : > { %1103 = vmatpush1.bf16.msra.mxu0 %v3996_v25  ;;  %v3440_v55 = vld [vmem:[%s695_s13] ss:$0 sm:$0xff]  ;;  %s4583_s13 = smov 64   ;;  %vm1638_vm5 = vcmask 64512   ;;  %p3561_p4 = scmp.ne.s32.totalorder %s4894_s10, 3 }
 0x16e   : > { %3673 = vmatpush3.bf16.msra.mxu1 %v3997_v26  ;;  %1104 = vmatprep.subr.bf16.mxu0 %v3998_v27  ;;  %v957_v62 = vsub.s32 0, %v5169_v61  ;;  %v961_v63 = vsub.s32 1, %v5169_v61  ;;  %v953_v0 = vld [vmem:[%s5071_s9] sm:$0x7]  ;;  %v965_v1 = vsub.s32 2, %v5169_v61  ;;  %s5556_s20 = sld [smem:[#allocation42_spill]] (!%p3561_p4) }
 0x16f   : > { %3674 = vmatprep.subr.bf16.mxu1 %v4578_v11 }
 0x170   : > { %v958_v2 = vrot.slane %v953_v0, %v957_v62  ;;  %v962_v3 = vrot.slane %v953_v0, %v961_v63  ;;  %v966_v6 = vrot.slane %v953_v0, %v965_v1 }
 0x171   : > { %1105 = vmatpush1.bf16.msra.mxu0 %v4000_v28 }
 0x172   : > { %3675 = vmatpush3.bf16.msra.mxu1 %v4001_v29  ;;  %1106 = vmatprep.subr.bf16.mxu0 %v4002_v30 }
 0x173   : > { %3676 = vmatprep.subr.bf16.mxu1 %v4578_v11 }
 0x175   : > { %1107 = vmatpush1.bf16.msra.mxu0 %v4004_v31 }
 0x176   : > { %3677 = vmatpush3.bf16.msra.mxu1 %v4005_v32  ;;  %1108 = vmatprep.subr.bf16.mxu0 %v4006_v33 }
 0x177   : > { %3678 = vmatprep.subr.bf16.mxu1 %v4578_v11 }
 0x179   : > { %1109 = vmatpush1.bf16.msra.mxu0 %v4008_v35 }
 0x17a   : > { %3679 = vmatpush3.bf16.msra.mxu1 %v4009_v36  ;;  %1110 = vmatprep.subr.bf16.mxu0 %v4010_v37 }
 0x17b   : > { %3680 = vmatprep.subr.bf16.mxu1 %v4578_v11 }
 0x17d   : > { %1111 = vmatpush1.bf16.msra.mxu0 %v4012_v38 }
 0x17e   : > { %3681 = vmatpush3.bf16.msra.mxu1 %v4013_v39  ;;  %1112 = vmatprep.subr.bf16.mxu0 %v4014_v40 }
 0x17f   : > { %3682 = vmatprep.subr.bf16.mxu1 %v4578_v11 }
 0x181   : > { %1113 = vmatpush1.bf16.msra.mxu0 %v4016_v41 }
 0x182   : > { %3683 = vmatpush3.bf16.msra.mxu1 %v4017_v42  ;;  %3688 = vmatprep.subr.bf16.mxu0 %v4578_v11 }
 0x183   : > { %3694 = vmatprep.subr.bf16.mxu1 %v4578_v11 }
 0x1ee   : > { %v882_v13 = vpop.xlane.xlu0 %881 }
 0x1ef   : > { %v886_v14 = vmul.f32 0.0078125, %v882_v13 }
 0x1f1   : > { %v5119_v15 = vsub.f32 %v877_v7, %v886_v14 }
 0x1f2   : > { %v884_v16 = vpop.xlane.xlu0 %883 }
 0x1f3   : > { %v887_v17 = vmul.f32 0.0078125, %v884_v16  ;;  %v890_v18 = vmul.f32 %v5119_v15, %v5119_v15 }
 0x1f5   : > { %v5123_v19 = vsub.f32 %v878_v8, %v887_v17  ;;  %892 = vadd.xlane.f32.xlu1 %v890_v18 }
 0x1f7   : > { %v891_v20 = vmul.f32 %v5123_v19, %v5123_v19 }
 0x1f9   : > { %894 = vadd.xlane.f32.xlu1 %v891_v20 }
 0x27e   : > { %v893_v43 = vpop.xlane.xlu1 %892 }
 0x27f   : > { %v896_v44 = vmul.f32 0.0078125, %v893_v43 }
 0x281   : > { %v898_v45 = vadd.f32 1e-05, %v896_v44 }
 0x282   : > { %v895_v46 = vpop.xlane.xlu1 %894 }
 0x283   : > { %4106 = vrsqrt.f32 %v898_v45  ;;  %v897_v47 = vmul.f32 0.0078125, %v895_v46 }
 0x285   : > { %v899_v48 = vadd.f32 1e-05, %v897_v47 }
 0x287   : > { %4108 = vrsqrt.f32 %v899_v48 }
 0x290   : > { %v4107_v49 = vpop.eup %4106 }
 0x291   : > { %v902_v50 = vmul.f32 %v4107_v49, %v5119_v15 }
 0x293   : > { %v910_v54 = vmul.f32 %v3439_v51, %v902_v50 }
 0x294   : > { %v4109_v52 = vpop.eup %4108 }
 0x295   : > { %v903_v53 = vmul.f32 %v4109_v52, %v5123_v19  ;;  %v918_v57 = vadd.f32 %v3440_v55, %v910_v54 }
 0x297   : > { %v911_v56 = vmul.f32 %v3439_v51, %v903_v53 }
 0x299   : > { %v919_v58 = vadd.f32 %v3440_v55, %v911_v56 }
 0x29b   : > { %v920_v59 = vpack.c.bf16 %v919_v58, %v918_v57 }
 0x29d   : > { %1131 = vmatmul.mubr.bf16.vlgmr.msra.gmra.mxu0 %v920_v59  ;;  %3685 = vmatmul.mubr.bf16.vlgmr.msra.gmra.mxu1 %v920_v59 }
 0x29e   : > { %3690 = vmatprep.mubr.msk.bf16.mxu0 %vm4580_vm2, %v4578_v11  ;;  %3696 = vmatprep.mubr.msk.bf16.mxu1 %vm4580_vm2, %v4578_v11 }
 0x35d   : > { %v1132_v4 = vpop.f32.mrf.mxu0  ;;  %v1175_v5 = vpop.f32.mrf.mxu1 }
 0x35e   : > { %v1133_v9 = vadd.f32 %v1132_v4, %v958_v2  ;;  %v5183_v17 = vadd.f32 %v1175_v5, %v966_v6 }
 0x35f   : > { %v1134_v7 = vpop.f32.mrf.mxu0  ;;  %v3686_v8 = vpop.f32.mrf.mxu1 }
 0x360   : > { %v1135_v10 = vadd.f32 %v1134_v7, %v962_v3  ;;  %v1182_v20 = vmul.f32 0.17677669, %v1133_v9 }
 0x361   : > { %v1136_v12 = vpop.f32.mrf.mxu0  ;;  %v1178_v13 = vpop.f32.mrf.mxu1 }
 0x362   : > { %v1137_v14 = vadd.f32 %v1136_v12, %v958_v2  ;;  %v5181_v15 = vadd.f32 %v1178_v13, %v966_v6  ;;  %v1232_v16 = vpack.c.bf16 %v1135_v10, %v1135_v10  ;;  %v1204_v29 = vpack.c.bf16 %v1182_v20, %v1182_v20  ;;  %v1268_v13 = vld [vmem:[#allocation2] sm:$0xff] }
 0x363   : > { %v1138_v18 = vpop.f32.mrf.mxu0  ;;  %v3687_v19 = vpop.f32.mrf.mxu1  ;;  %v1260_v6 = vpack.c.bf16 %v5183_v17, %v5183_v17 }
 0x364   : > { %v1183_v21 = vmul.f32 0.17677669, %v1137_v14  ;;  %v1139_v22 = vadd.f32 %v1138_v18, %v962_v3  ;;  %v1274_v23 = vsel %vm1269_vm3, %v1232_v16, 0  ;;  %v5188_v24 = vpack.i.bf16 %v5181_v15, %v5183_v17 }
 0x365   : > { %3689 = vmatpush3.bf16.xpose.msra.mxu0 %v1274_v23  ;;  %v1261_v7 = vpack.c.bf16 %v5181_v15, %v5181_v15 }
 0x366   : > { %v3941_v25 = vpack.i.bf16 %v1139_v22, %v1135_v10  ;;  %v3946_v26 = vpack.i.bf16 %v1183_v21, %v1182_v20  ;;  %v1233_v27 = vpack.c.bf16 %v1139_v22, %v1139_v22  ;;  %3700 = vmatprep.subr.bf16.mxu0 %v4578_v11  ;;  %v1205_v30 = vpack.c.bf16 %v1183_v21, %v1183_v21 }
 0x367   : > { %v1740_v10 = vsel %vm1738_vm4, %v1260_v6, 0  ;;  %v1786_v12 = vsel %vm1738_vm4, %v1261_v7, 0 }
 0x368   : > { %3942 = vrot.lane.b32.xlu0 %v3941_v25, %s4581_s24  ;;  %3947 = vrot.lane.b32.xlu1 %v3946_v26, %s4581_s24  ;;  %v1320_v28 = vsel %vm1269_vm3, %v1233_v27, 0 }
 0x369   : > { %3695 = vmatpush3.bf16.xpose.msra.mxu1 %v1320_v28 }
 0x36a   : > { %3706 = vmatprep.subr.bf16.mxu1 %v4578_v11 }
 0x36c   : > { %3962 = vrot.lane.b32.xlu0 %v3941_v25, %s4582_s25  ;;  %3952 = vrot.lane.b32.xlu1 %v3941_v25, %s4583_s13 }
 0x36d   : > { %3691 = vmatmul.mubr.msk.bf16.vlgmr.msra.gmra.mxu0 %vm1269_vm3, %v1204_v29 }
 0x36e   : > { %3702 = vmatprep.mubr.msk.bf16.mxu0 %vm4580_vm2, %v4578_v11 }
 0x370   : > { %3697 = vmatmul.mubr.msk.bf16.vlgmr.msra.gmra.mxu1 %vm1269_vm3, %v1205_v30  ;;  %3957 = vrot.lane.b32.xlu1 %v3946_v26, %s4583_s13 }
 0x371   : > { %3708 = vmatprep.mubr.msk.bf16.mxu1 %vm4580_vm2, %v4578_v11 }
 0x374   : > { %3967 = vrot.lane.b32.xlu1 %v3946_v26, %s4582_s25 }
 0x3da   : > { %v3943_v31 = vpop.permute.xlu0 %3942  ;;  %v3948_v32 = vpop.permute.xlu1 %3947 }
 0x3db   : > { %v3945_v33 = vunpack.i.h.bf16 %v3943_v31  ;;  %v3944_v35 = vunpack.i.l.bf16 %v3943_v31  ;;  %v3949_v43 = vunpack.i.l.bf16 %v3948_v32  ;;  %v3950_v44 = vunpack.i.h.bf16 %v3948_v32 }
 0x3dd   : > { %v1235_v36 = vpack.c.bf16 %v3945_v33, %v3945_v33  ;;  %v1234_v37 = vpack.c.bf16 %v3944_v35, %v3944_v35  ;;  %v1206_v48 = vpack.c.bf16 %v3949_v43, %v3949_v43  ;;  %v1207_v49 = vpack.c.bf16 %v3950_v44, %v3950_v44 }
 0x3de   : > { %v3953_v38 = vpop.permute.xlu1 %3952  ;;  %v3963_v46 = vpop.permute.xlu0 %3962 }
 0x3df   : > { %v3954_v39 = vunpack.i.l.bf16 %v3953_v38  ;;  %v1366_v40 = vsel %vm1269_vm3, %v1234_v37, 0  ;;  %v1412_v41 = vsel %vm1269_vm3, %v1235_v36, 0  ;;  %v3955_v42 = vunpack.i.h.bf16 %v3953_v38 }
 0x3e0   : > { %3701 = vmatpush3.bf16.xpose.msra.mxu0 %v1366_v40  ;;  %3707 = vmatpush3.bf16.xpose.msra.mxu1 %v1412_v41  ;;  %v3964_v51 = vunpack.i.l.bf16 %v3963_v46  ;;  %v3965_v53 = vunpack.i.h.bf16 %v3963_v46 }
 0x3e1   : > { %3712 = vmatprep.subr.bf16.mxu0 %v4578_v11  ;;  %3718 = vmatprep.subr.bf16.mxu1 %v4578_v11  ;;  %v1236_v45 = vpack.c.bf16 %v3954_v39, %v3954_v39  ;;  %v1237_v47 = vpack.c.bf16 %v3955_v42, %v3955_v42 }
 0x3e2   : > { %v3958_v50 = vpop.permute.xlu1 %3957  ;;  %v1238_v57 = vpack.c.bf16 %v3964_v51, %v3964_v51  ;;  %v1239_v58 = vpack.c.bf16 %v3965_v53, %v3965_v53 }
 0x3e3   : > { %v1458_v52 = vsel %vm1269_vm3, %v1236_v45, 0  ;;  %v1504_v54 = vsel %vm1269_vm3, %v1237_v47, 0  ;;  %v3959_v55 = vunpack.i.l.bf16 %v3958_v50  ;;  %v3960_v56 = vunpack.i.h.bf16 %v3958_v50 }
 0x3e4   : > { %v1550_v2 = vsel %vm1269_vm3, %v1238_v57, 0  ;;  %v1596_v3 = vsel %vm1269_vm3, %v1239_v58, 0 }
 0x3e5   : > { %v1208_v59 = vpack.c.bf16 %v3959_v55, %v3959_v55  ;;  %v1209_v60 = vpack.c.bf16 %v3960_v56, %v3960_v56 }
 0x3e6   : > { %v3968_v0 = vpop.permute.xlu1 %3967 }
 0x3e7   : > { %3703 = vmatmul.mubr.msk.bf16.vlgmr.msra.gmra.mxu0 %vm1269_vm3, %v1206_v48  ;;  %3709 = vmatmul.mubr.msk.bf16.vlgmr.msra.gmra.mxu1 %vm1269_vm3, %v1207_v49  ;;  %v3969_v4 = vunpack.i.l.bf16 %v3968_v0  ;;  %v3970_v5 = vunpack.i.h.bf16 %v3968_v0 }
 0x3e8   : > { %3713 = vmatpush3.bf16.xpose.msra.mxu0 %v1458_v52  ;;  %3719 = vmatpush3.bf16.xpose.msra.mxu1 %v1504_v54 }
 0x3e9   : > { %3714 = vmatprep.mubr.msk.bf16.mxu0 %vm4580_vm2, %v4578_v11  ;;  %3720 = vmatprep.mubr.msk.bf16.mxu1 %vm4580_vm2, %v4578_v11  ;;  %v1210_v8 = vpack.c.bf16 %v3969_v4, %v3969_v4  ;;  %v1211_v9 = vpack.c.bf16 %v3970_v5, %v3970_v5 }
 0x3ea   : > { %3724 = vmatprep.subr.bf16.mxu0 %v4578_v11  ;;  %3730 = vmatprep.subr.bf16.mxu1 %v4578_v11 }
 0x3ef   : > { %3715 = vmatmul.mubr.msk.bf16.vlgmr.msra.gmra.mxu0 %vm1269_vm3, %v1208_v59  ;;  %3721 = vmatmul.mubr.msk.bf16.vlgmr.msra.gmra.mxu1 %vm1269_vm3, %v1209_v60 }
 0x3f0   : > { %3725 = vmatpush3.bf16.xpose.msra.mxu0 %v1550_v2  ;;  %3731 = vmatpush3.bf16.xpose.msra.mxu1 %v1596_v3 }
 0x3f1   : > { %3726 = vmatprep.mubr.msk.bf16.mxu0 %vm4580_vm2, %v4578_v11  ;;  %3732 = vmatprep.mubr.msk.bf16.mxu1 %vm4580_vm2, %v4578_v11 }
 0x3f2   : > { %3736 = vmatprep.subr.bf16.mxu0 %v4578_v11  ;;  %3742 = vmatprep.subr.bf16.mxu1 %v4578_v11 }
 0x3f7   : > { %3727 = vmatmul.mubr.msk.bf16.vlgmr.msra.gmra.mxu0 %vm1269_vm3, %v1210_v8  ;;  %3733 = vmatmul.mubr.msk.bf16.vlgmr.msra.gmra.mxu1 %vm1269_vm3, %v1211_v9 }
 0x3f8   : > { %3737 = vmatpush3.bf16.msra.mxu0 %v1740_v10  ;;  %3743 = vmatpush3.bf16.msra.mxu1 %v1786_v12 }
 0x3f9   : > { %3738 = vmatprep.mubr.msk.bf16.mxu0 %vm4580_vm2, %v4578_v11  ;;  %3744 = vmatprep.mubr.msk.bf16.mxu1 %vm4580_vm2, %v4578_v11 }
 0x3fa   : > { %3748 = vmatprep.subr.bf16.mxu0 %v4578_v11  ;;  %3754 = vmatprep.subr.bf16.mxu1 %v4578_v11 }
 0x42d   : > { %v1310_v14 = vpop.f32.mrf.mxu0 }
 0x42e   : > { %v1311_v15 = vadd.f32 %v1310_v14, %v1268_v13 }
 0x42f   : > { %v3692_v16 = vpop.f32.mrf.mxu0 }
 0x430   : > { %v1356_v17 = vpop.f32.mrf.mxu1  ;;  %v1639_v18 = vsel %vm1638_vm5, %v1311_v15, -inf }
 0x431   : > { %v1357_v19 = vadd.f32 %v1356_v17, %v1268_v13  ;;  %1640 = vmax.xlane.f32.xlu0 %v1639_v18  ;;  %v1313_v20 = vpop.f32.mrf.mxu0 }
 0x432   : > { %v3698_v21 = vpop.f32.mrf.mxu1 }
 0x433   : > { %v3693_v22 = vpop.f32.mrf.mxu0  ;;  %v1642_v23 = vsel %vm1638_vm5, %v1357_v19, -inf }
 0x434   : > { %v1359_v25 = vpop.f32.mrf.mxu1  ;;  %1643 = vmax.xlane.f32.xlu1 %v1642_v23 }
 0x436   : > { %v3699_v26 = vpop.f32.mrf.mxu1 }
 0x4a7   : > { %v1402_v27 = vpop.f32.mrf.mxu0  ;;  %v1448_v29 = vpop.f32.mrf.mxu1 }
 0x4a8   : > { %v1403_v28 = vadd.f32 %v1402_v27, %v1268_v13  ;;  %v1449_v31 = vadd.f32 %v1448_v29, %v1268_v13 }
 0x4a9   : > { %v3704_v30 = vpop.f32.mrf.mxu0  ;;  %v3710_v32 = vpop.f32.mrf.mxu1 }
 0x4aa   : > { %v1645_v33 = vsel %vm1638_vm5, %v1403_v28, -inf  ;;  %v1648_v39 = vsel %vm1638_vm5, %v1449_v31, -inf }
 0x4ab   : > { %1646 = vmax.xlane.f32.xlu0 %v1645_v33  ;;  %v1405_v35 = vpop.f32.mrf.mxu0  ;;  %v1451_v36 = vpop.f32.mrf.mxu1 }
 0x4ad   : > { %v3705_v37 = vpop.f32.mrf.mxu0  ;;  %v3711_v38 = vpop.f32.mrf.mxu1 }
 0x4af   : > { %1649 = vmax.xlane.f32.xlu0 %v1648_v39  ;;  %v1494_v40 = vpop.f32.mrf.mxu0  ;;  %v1540_v41 = vpop.f32.mrf.mxu1 }
 0x4b0   : > { %v1495_v42 = vadd.f32 %v1494_v40, %v1268_v13  ;;  %v1541_v43 = vadd.f32 %v1540_v41, %v1268_v13 }
 0x4b1   : > { %v3716_v44 = vpop.f32.mrf.mxu0  ;;  %v3722_v45 = vpop.f32.mrf.mxu1 }
 0x4b2   : > { %v1651_v46 = vsel %vm1638_vm5, %v1495_v42, -inf  ;;  %v1654_v47 = vsel %vm1638_vm5, %v1541_v43, -inf }
 0x4b3   : > { %1652 = vmax.xlane.f32.xlu0 %v1651_v46  ;;  %v1497_v48 = vpop.f32.mrf.mxu0  ;;  %1655 = vmax.xlane.f32.xlu1 %v1654_v47  ;;  %v1543_v49 = vpop.f32.mrf.mxu1 }
 0x4b5   : > { %v3717_v50 = vpop.f32.mrf.mxu0  ;;  %v3723_v51 = vpop.f32.mrf.mxu1 }
 0x4b7   : > { %v1586_v52 = vpop.f32.mrf.mxu0  ;;  %v1632_v54 = vpop.f32.mrf.mxu1 }
 0x4b8   : > { %v1587_v53 = vadd.f32 %v1586_v52, %v1268_v13  ;;  %v5249_v55 = vadd.f32 %v1632_v54, %v1268_v13 }
 0x4b9   : > { %v3728_v57 = vpop.f32.mrf.mxu0  ;;  %v3734_v58 = vpop.f32.mrf.mxu1 }
 0x4ba   : > { %v1641_v56 = vpop.xlane.xlu0 %1640  ;;  %v1657_v60 = vsel %vm1638_vm5, %v1587_v53, -inf  ;;  %v1660_v0 = vsel %vm1638_vm5, %v5249_v55, -inf }
 0x4bb   : > { %v1663_v59 = vsub.f32 %v1311_v15, %v1641_v56  ;;  %1658 = vmax.xlane.f32.xlu0 %v1657_v60  ;;  %v1589_v2 = vpop.f32.mrf.mxu0  ;;  %1661 = vmax.xlane.f32.xlu1 %v1660_v0  ;;  %v1635_v4 = vpop.f32.mrf.mxu1 }
 0x4bd   : > { %v1671_v3 = vmul.f32 1.442695, %v1663_v59  ;;  %v1644_v5 = vpop.xlane.xlu1 %1643  ;;  %v3729_v7 = vpop.f32.mrf.mxu0 }
 0x4be   : > { %v1664_v6 = vsub.f32 %v1357_v19, %v1644_v5  ;;  %v3735_v8 = vpop.f32.mrf.mxu1 }
 0x4bf   : > { %4110 = vpow2.f32 %v1671_v3 }
 0x4c0   : > { %v1673_v9 = vmul.f32 1.442695, %v1664_v6 }
 0x4c2   : > { %4112 = vpow2.f32 %v1673_v9 }
 0x4cc   : > { %v4111_v10 = vpop.eup %4110 }
 0x4cd   : > { %v1687_v12 = vsel %vm1638_vm5, %v4111_v10, 0.0 }
 0x4ce   : > { %1688 = vadd.xlane.f32.xlu0 %v1687_v12 }
 0x4cf   : > { %v4113_v13 = vpop.eup %4112 }
 0x4d0   : > { %v1690_v14 = vsel %vm1638_vm5, %v4113_v13, 0.0 }
 0x4d1   : > { %1691 = vadd.xlane.f32.xlu1 %v1690_v14 }
 0x534   : > { %v1647_v15 = vpop.xlane.xlu0 %1646 }
 0x535   : > { %v1665_v16 = vsub.f32 %v1403_v28, %v1647_v15 }
 0x537   : > { %v1675_v17 = vmul.f32 1.442695, %v1665_v16 }
 0x538   : > { %v1650_v18 = vpop.xlane.xlu0 %1649 }
 0x539   : > { %4114 = vpow2.f32 %v1675_v17  ;;  %v1666_v20 = vsub.f32 %v1449_v31, %v1650_v18 }
 0x53b   : > { %v1677_v19 = vmul.f32 1.442695, %v1666_v20 }
 0x53c   : > { %v1653_v21 = vpop.xlane.xlu0 %1652  ;;  %v1656_v22 = vpop.xlane.xlu1 %1655 }
 0x53d   : > { %4116 = vpow2.f32 %v1677_v19  ;;  %v1667_v23 = vsub.f32 %v1495_v42, %v1653_v21  ;;  %v1668_v25 = vsub.f32 %v1541_v43, %v1656_v22 }
 0x53f   : > { %v1679_v26 = vmul.f32 1.442695, %v1667_v23  ;;  %v1681_v27 = vmul.f32 1.442695, %v1668_v25 }
 0x541   : > { %4118 = vpow2.f32 %v1679_v26 }
 0x542   : > { %4120 = vpow2.f32 %v1681_v27 }
 0x544   : > { %v1659_v29 = vpop.xlane.xlu0 %1658  ;;  %v1662_v40 = vpop.xlane.xlu1 %1661 }
 0x545   : > { %v1669_v30 = vsub.f32 %v1587_v53, %v1659_v29  ;;  %v1670_v51 = vsub.f32 %v5249_v55, %v1662_v40 }
 0x546   : > { %v4115_v32 = vpop.eup %4114 }
 0x547   : > { %v1683_v33 = vmul.f32 1.442695, %v1669_v30  ;;  %v1693_v28 = vsel %vm1638_vm5, %v4115_v32, 0.0  ;;  %v1685_v52 = vmul.f32 1.442695, %v1670_v51 }
 0x548   : > { %1694 = vadd.xlane.f32.xlu0 %v1693_v28 }
 0x549   : > { %4122 = vpow2.f32 %v1683_v33 }
 0x54a   : > { %v4117_v35 = vpop.eup %4116 }
 0x54b   : > { %v1696_v31 = vsel %vm1638_vm5, %v4117_v35, 0.0 }
 0x54c   : > { %1697 = vadd.xlane.f32.xlu1 %v1696_v31 }
 0x54e   : > { %v5258_v36 = vpop.eup %4118 }
 0x54f   : > { %v5260_v37 = vpop.eup %4120  ;;  %v1699_v38 = vsel %vm1638_vm5, %v5258_v36, 0.0 }
 0x550   : > { %v1702_v39 = vsel %vm1638_vm5, %v5260_v37, 0.0  ;;  %1700 = vadd.xlane.f32.xlu0 %v1699_v38  ;;  %v4020_v38 = vld [vmem:[%s5074_s16 + $0x18] sm:$0xff]  }
 0x551   : > { %1703 = vadd.xlane.f32.xlu1 %v1702_v39 }
 0x556   : > { %v5266_v41 = vpop.eup %4122 }
 0x557   : > { %v1689_v42 = vpop.xlane.xlu0 %1688  ;;  %v1705_v43 = vsel %vm1638_vm5, %v5266_v41, 0.0 }
 0x558   : > { %4124 = vrcp.f32 %v1689_v42  ;;  %1706 = vadd.xlane.f32.xlu0 %v1705_v43  ;;  %v4018_v42 = vld [vmem:[%s5074_s16 + $0x8] sm:$0xff]  }
 0x55a   : > { %v1692_v44 = vpop.xlane.xlu1 %1691 }
 0x55b   : > { %4126 = vrcp.f32 %v1692_v44  ;;  %v4019_v44 = vld [vmem:[%s5074_s16] sm:$0xff]  }
 0x55c   : > { %4128 = vpow2.f32 %v1685_v52 }
 0x562   : > { %3977 = vrot.lane.b32.xlu1 %v5188_v24, %s4583_s13 }
 0x565   : > { %v4125_v45 = vpop.eup %4124 }
 0x566   : > { %v1719_v46 = vmul.f32 %v4125_v45, %v4111_v10 }
 0x568   : > { %v4127_v47 = vpop.eup %4126  ;;  %v1727_v48 = vpack.c.bf16 %v1719_v46, %v1719_v46 }
 0x569   : > { %v1720_v49 = vmul.f32 %v4127_v47, %v4113_v13  ;;  %v5281_v53 = vpop.eup %4128 }
 0x56a   : > { %3739 = vmatmul.mubr.msk.bf16.vlgmr.msra.gmra.mxu0 %vm1638_vm5, %v1727_v48  ;;  %v1708_v54 = vsel %vm1638_vm5, %v5281_v53, 0.0 }
 0x56b   : > { %v1728_v50 = vpack.c.bf16 %v1720_v49, %v1720_v49  ;;  %3750 = vmatprep.mubr.msk.bf16.mxu0 %vm4580_vm2, %v4578_v11 }
 0x56d   : > { %3745 = vmatmul.mubr.msk.bf16.vlgmr.msra.gmra.mxu1 %vm1638_vm5, %v1728_v50  ;;  %v4021_v50 = vld [vmem:[%s5074_s16 + $0x10] sm:$0xff]  }
 0x56e   : > { %3756 = vmatprep.mubr.msk.bf16.mxu1 %vm4580_vm2, %v4578_v11  ;;  %3972 = vrot.lane.b32.xlu0 %v5188_v24, %s4581_s24 }
 0x586   : > { %1709 = vadd.xlane.f32.xlu1 %v1708_v54 }
 0x597   : > { %3982 = vrot.lane.b32.xlu1 %v5188_v24, %s4582_s25 }
 0x5d1   : > { %v1695_v56 = vpop.xlane.xlu0 %1694 }
 0x5d2   : > { %4130 = vrcp.f32 %v1695_v56  ;;  %v4024_v56 = vld [vmem:[%s5074_s16 + $0x38] sm:$0xff]  }
 0x5d5   : > { %v1698_v57 = vpop.xlane.xlu1 %1697 }
 0x5d6   : > { %4132 = vrcp.f32 %v1698_v57  ;;  %v4025_v57 = vld [vmem:[%s5074_s16 + $0x30] sm:$0xff]  }
 0x5d9   : > { %v1701_v55 = vpop.xlane.xlu0 %1700 }
 0x5da   : > { %v1704_v58 = vpop.xlane.xlu1 %1703  ;;  %4134 = vrcp.f32 %v1701_v55 }
 0x5db   : > { %4136 = vrcp.f32 %v1704_v58 }
 0x5de   : > { %v3978_v60 = vpop.permute.xlu1 %3977 }
 0x5df   : > { %v4131_v0 = vpop.eup %4130  ;;  %v3980_v4 = vunpack.i.h.bf16 %v3978_v60  ;;  %v3979_v5 = vunpack.i.l.bf16 %v3978_v60 }
 0x5e0   : > { %v1721_v24 = vmul.f32 %v4131_v0, %v4115_v32 }
 0x5e1   : > { %v1707_v59 = vpop.xlane.xlu0 %1706  ;;  %v1265_v12 = vpack.c.bf16 %v3980_v4, %v3980_v4  ;;  %v1264_v13 = vpack.c.bf16 %v3979_v5, %v3979_v5  ;;  %v4023_v5 = vld [vmem:[%s5074_s16 + $0x20] sm:$0xff]  }
 0x5e2   : > { %v1729_v17 = vpack.c.bf16 %v1721_v24, %v1721_v24  ;;  %4138 = vrcp.f32 %v1707_v59  ;;  %v4022_v59 = vld [vmem:[%s5074_s16 + $0x28] sm:$0xff]  }
 0x5e3   : > { %v4133_v2 = vpop.eup %4132  ;;  %v1924_v19 = vsel %vm1738_vm4, %v1264_v13, 0  ;;  %v1970_v21 = vsel %vm1738_vm4, %v1265_v12, 0 }
 0x5e4   : > { %v1722_v10 = vmul.f32 %v4133_v2, %v4117_v35 }
 0x5e5   : > { %v3973_v3 = vpop.permute.xlu0 %3972 }
 0x5e6   : > { %v3975_v6 = vunpack.i.h.bf16 %v3973_v3  ;;  %v3974_v7 = vunpack.i.l.bf16 %v3973_v3  ;;  %v1730_v18 = vpack.c.bf16 %v1722_v10, %v1722_v10 }
 0x5e7   : > { %v4135_v16 = vpop.eup %4134 }
 0x5e8   : > { %v1263_v8 = vpack.c.bf16 %v3975_v6, %v3975_v6  ;;  %v1262_v9 = vpack.c.bf16 %v3974_v7, %v3974_v7  ;;  %v4137_v20 = vpop.eup %4136  ;;  %v1723_v22 = vmul.f32 %v4135_v16, %v5258_v36 }
 0x5e9   : > { %v1724_v23 = vmul.f32 %v4137_v20, %v5260_v37 }
 0x5ea   : > { %v1832_v14 = vsel %vm1738_vm4, %v1262_v9, 0  ;;  %v1878_v15 = vsel %vm1738_vm4, %v1263_v8, 0  ;;  %v1731_v25 = vpack.c.bf16 %v1723_v22, %v1723_v22 }
 0x5eb   : > { %3749 = vmatpush3.bf16.msra.mxu0 %v1832_v14  ;;  %3755 = vmatpush3.bf16.msra.mxu1 %v1878_v15  ;;  %v1732_v26 = vpack.c.bf16 %v1724_v23, %v1724_v23 }
 0x5ec   : > { %3760 = vmatprep.subr.bf16.mxu0 %v4578_v11  ;;  %3766 = vmatprep.subr.bf16.mxu1 %v4578_v11 }
 0x5ee   : > { %3751 = vmatmul.mubr.msk.bf16.vlgmr.msra.gmra.mxu0 %vm1638_vm5, %v1729_v17  ;;  %3757 = vmatmul.mubr.msk.bf16.vlgmr.msra.gmra.mxu1 %vm1638_vm5, %v1730_v18 }
 0x5ef   : > { %3761 = vmatpush3.bf16.msra.mxu0 %v1924_v19  ;;  %3767 = vmatpush3.bf16.msra.mxu1 %v1970_v21  ;;  %v4139_v29 = vpop.eup %4138 }
 0x5f0   : > { %3762 = vmatprep.mubr.msk.bf16.mxu0 %vm4580_vm2, %v4578_v11  ;;  %3768 = vmatprep.mubr.msk.bf16.mxu1 %vm4580_vm2, %v4578_v11  ;;  %v1725_v31 = vmul.f32 %v4139_v29, %v5266_v41 }
 0x5f1   : > { %3772 = vmatprep.subr.bf16.mxu0 %v4578_v11  ;;  %3778 = vmatprep.subr.bf16.mxu1 %v4578_v11 }
 0x5f2   : > { %v1733_v39 = vpack.c.bf16 %v1725_v31, %v1725_v31 }
 0x5f6   : > { %3763 = vmatmul.mubr.msk.bf16.vlgmr.msra.gmra.mxu0 %vm1638_vm5, %v1731_v25  ;;  %3769 = vmatmul.mubr.msk.bf16.vlgmr.msra.gmra.mxu1 %vm1638_vm5, %v1732_v26 }
 0x5f7   : > { %3774 = vmatprep.mubr.msk.bf16.mxu0 %vm4580_vm2, %v4578_v11  ;;  %3780 = vmatprep.mubr.msk.bf16.mxu1 %vm4580_vm2, %v4578_v11 }
 0x60f   : > { %v1710_v27 = vpop.xlane.xlu1 %1709 }
 0x610   : > { %4140 = vrcp.f32 %v1710_v27 }
 0x613   : > { %v3983_v30 = vpop.permute.xlu1 %3982 }
 0x614   : > { %v3985_v32 = vunpack.i.h.bf16 %v3983_v30  ;;  %v3984_v33 = vunpack.i.l.bf16 %v3983_v30 }
 0x616   : > { %v1267_v28 = vpack.c.bf16 %v3985_v32, %v3985_v32  ;;  %v1266_v35 = vpack.c.bf16 %v3984_v33, %v3984_v33 }
 0x618   : > { %v2016_v36 = vsel %vm1738_vm4, %v1266_v35, 0  ;;  %v2062_v37 = vsel %vm1738_vm4, %v1267_v28, 0 }
 0x619   : > { %3773 = vmatpush3.bf16.msra.mxu0 %v2016_v36  ;;  %3779 = vmatpush3.bf16.msra.mxu1 %v2062_v37 }
 0x61a   : > { %3792 = vmatprep.subr.bf16.mxu1 %v4578_v11  ;;  %3784 = vmatprep.subr.bf16.mxu0 %v4578_v11 }
 0x61c   : > { %3775 = vmatmul.mubr.msk.bf16.vlgmr.msra.gmra.mxu0 %vm1638_vm5, %v1733_v39 }
 0x61d   : > { %v4141_v40 = vpop.eup %4140  ;;  %3785 = vmatpush3.bf16.msra.mxu0 %v4020_v38  ;;  %3788 = vmatprep.mubr.msk.bf16.mxu0 %vm4580_vm2, %v4578_v11 }
 0x61e   : > { %v1726_v41 = vmul.f32 %v4141_v40, %v5281_v53  ;;  %3786 = vmatprep.subr.bf16.mxu0 %v4578_v11 }
 0x620   : > { %v1734_v43 = vpack.c.bf16 %v1726_v41, %v1726_v41 }
 0x621   : > { %3787 = vmatpush3.bf16.msra.mxu0 %v4021_v50 }
 0x622   : > { %3781 = vmatmul.mubr.msk.bf16.vlgmr.msra.gmra.mxu1 %vm1638_vm5, %v1734_v43  ;;  %3800 = vmatprep.subr.bf16.mxu0 %v4578_v11 }
 0x623   : > { %3793 = vmatpush3.bf16.msra.mxu1 %v4018_v42  ;;  %3796 = vmatprep.mubr.msk.bf16.mxu1 %vm4580_vm2, %v4578_v11 }
 0x624   : > { %3794 = vmatprep.subr.bf16.mxu1 %v4578_v11 }
 0x627   : > { %3795 = vmatpush3.bf16.msra.mxu1 %v4019_v44  ;;  %v3493_v44 = vld [vmem:[%s730_s17] ss:$0 sm:$0xff] }
 0x628   : > { %3808 = vmatprep.subr.bf16.mxu1 %v4578_v11 }
 0x62a   : > { %v1776_v45 = vpop.f32.mrf.mxu0 }
 0x62c   : > { %v3740_v46 = vpop.f32.mrf.mxu0 }
 0x62d   : > { %v1822_v47 = vpop.f32.mrf.mxu1  ;;  %v4162_v46 = vld [vmem:[#allocation21] sm:$0xff] }
 0x62e   : > { %v1779_v48 = vpop.f32.mrf.mxu0  ;;  %v2104_v49 = vpack.c.bf16 %v1822_v47, %v1776_v45 }
 0x62f   : > { %v3746_v51 = vpop.f32.mrf.mxu1 }
 0x630   : > { %v3741_v52 = vpop.f32.mrf.mxu0  ;;  %3797 = vmatmul.mubr.msk.bf16.vlgmr.msra.gmra.mxu1 %vm1269_vm3, %v2104_v49 }
 0x631   : > { %v1825_v53 = vpop.f32.mrf.mxu1  ;;  %3812 = vmatprep.mubr.msk.bf16.mxu1 %vm4580_vm2, %v4578_v11  ;;  %3809 = vmatpush3.bf16.msra.mxu1 %v4024_v56  ;;  %v4163_v52 = vld [vmem:[#allocation21 + $0x8] sm:$0xff]  ;;  %v4026_v56 = vld [vmem:[%s5090_s21 + $0xe0] ss:$16 sps:$4 sm:$0xff]  }
 0x632   : > { %3810 = vmatprep.subr.bf16.mxu1 %v4578_v11 }
 0x633   : > { %v3747_v54 = vpop.f32.mrf.mxu1 }
 0x635   : > { %3811 = vmatpush3.bf16.msra.mxu1 %v4025_v57  ;;  %v4028_v57 = vld [vmem:[%s5090_s21 + $0xe4] ss:$16 sps:$4 sm:$0xff]  }
 0x6ae   : > { %v1868_v55 = vpop.f32.mrf.mxu0  ;;  %v1914_v58 = vpop.f32.mrf.mxu1 }
 0x6af   : > { %v2121_v60 = vpack.c.bf16 %v1914_v58, %v1868_v55  ;;  %v4029_v55 = vld [vmem:[%s5090_s21 + $0xe8] ss:$16 sps:$4 sm:$0xff]   ;;  %v4031_v58 = vld [vmem:[%s5090_s21 + $0xec] ss:$16 sps:$4 sm:$0xff]  }
 0x6b0   : > { %v3752_v0 = vpop.f32.mrf.mxu0  ;;  %v3758_v2 = vpop.f32.mrf.mxu1  ;;  %2661 = vmatprep.subr.bf16.mxu1 %v4031_v58  ;;  %v4078_v58 = vld [vmem:[%s5110_s22 + $0x70] sm:$0xff]  }
 0x6b1   : > { %3789 = vmatmul.mubr.msk.bf16.vlgmr.msra.gmra.mxu0 %vm1269_vm3, %v2121_v60 }
 0x6b2   : > { %v1871_v3 = vpop.f32.mrf.mxu0  ;;  %v1917_v4 = vpop.f32.mrf.mxu1  ;;  %3801 = vmatpush3.bf16.msra.mxu0 %v4022_v59  ;;  %3804 = vmatprep.mubr.msk.bf16.mxu0 %vm4580_vm2, %v4578_v11 }
 0x6b3   : > { %3802 = vmatprep.subr.bf16.mxu0 %v4578_v11 }
 0x6b4   : > { %v3753_v6 = vpop.f32.mrf.mxu0  ;;  %v3759_v7 = vpop.f32.mrf.mxu1 }
 0x6b5   : > { %v4034_v7 = vld [vmem:[%s5090_s21 + $0xc4] ss:$16 sps:$4 sm:$0xff]  }
 0x6b6   : > { %v1960_v8 = vpop.f32.mrf.mxu0  ;;  %v2006_v9 = vpop.f32.mrf.mxu1  ;;  %3803 = vmatpush3.bf16.msra.mxu0 %v4023_v5 }
 0x6b7   : > { %v2234_v24 = vpack.c.bf16 %v2006_v9, %v1960_v8  ;;  %2618 = vmatprep.subr.bf16.mxu0 %v4028_v57  ;;  %v4037_v8 = vld [vmem:[%s5090_s21 + $0xcc] ss:$16 sps:$4 sm:$0xff]   ;;  %v4032_v9 = vld [vmem:[%s5090_s21 + $0xc0] ss:$16 sps:$4 sm:$0xff]  }
 0x6b8   : > { %v3764_v10 = vpop.f32.mrf.mxu0  ;;  %v3770_v12 = vpop.f32.mrf.mxu1  ;;  %v4076_v57 = vld [vmem:[%s5110_s22 + $0x38] sm:$0xff]  }
 0x6b9   : > { %3805 = vmatmul.mubr.msk.bf16.vlgmr.msra.gmra.mxu0 %vm1269_vm3, %v2234_v24  ;;  %v4035_v24 = vld [vmem:[%s5090_s21 + $0xc8] ss:$16 sps:$4 sm:$0xff]   ;;  %v4040_v10 = vld [vmem:[%s5090_s21 + $0xa4] ss:$16 sps:$4 sm:$0xff]   ;;  %v4043_v12 = vld [vmem:[%s5090_s21 + $0xac] ss:$16 sps:$4 sm:$0xff]  }
 0x6ba   : > { %v1963_v13 = vpop.f32.mrf.mxu0  ;;  %v2009_v14 = vpop.f32.mrf.mxu1  ;;  %2650 = vmatprep.mubr.bf16.mxu0 %v4579_v34  ;;  %2619 = vmatpush1.bf16.msra.mxu0 %v4026_v56  ;;  %v4075_v56 = vld [vmem:[%s5110_s22 + $0xf8] sm:$0xff]  }
 0x6bb   : > { %2620 = vmatprep.subr.bf16.mxu0 %v4034_v7  ;;  %v4038_v13 = vld [vmem:[%s5090_s21 + $0xa0] ss:$16 sps:$4 sm:$0xff]   ;;  %v4041_v14 = vld [vmem:[%s5090_s21 + $0xa8] ss:$16 sps:$4 sm:$0xff]  }
 0x6bc   : > { %v3765_v15 = vpop.f32.mrf.mxu0  ;;  %v3771_v16 = vpop.f32.mrf.mxu1  ;;  %v4087_v7 = vld [vmem:[%s5110_s22 + $0xe0] sm:$0xff]  }
 0x6bd   : > { %v4044_v15 = vld [vmem:[%s5090_s21 + $0x80] ss:$16 sps:$4 sm:$0xff]   ;;  %v4046_v16 = vld [vmem:[%s5090_s21 + $0x84] ss:$16 sps:$4 sm:$0xff]  }
 0x6be   : > { %2621 = vmatpush1.bf16.msra.mxu0 %v4032_v9  ;;  %v4089_v9 = vld [vmem:[%s5110_s22 + $0xa0] sm:$0xff]  }
 0x6bf   : > { %2622 = vmatprep.subr.bf16.mxu0 %v4040_v10  ;;  %v4091_v10 = vld [vmem:[%s5110_s22 + $0xd8] sm:$0xff]  }
 0x6c2   : > { %2623 = vmatpush1.bf16.msra.mxu0 %v4038_v13  ;;  %v4093_v13 = vld [vmem:[%s5110_s22 + $0x98] sm:$0xff]  }
 0x6c3   : > { %2624 = vmatprep.subr.bf16.mxu0 %v4046_v16  ;;  %v4096_v16 = vld [vmem:[%s5110_s22 + $0x10] sm:$0xff]  }
 0x6c6   : > { %2625 = vmatpush1.bf16.msra.mxu0 %v4044_v15  ;;  %v4095_v15 = vld [vmem:[%s5110_s22 + $0xd0] sm:$0xff]  }
 0x6dc   : > { %v2052_v17 = vpop.f32.mrf.mxu0 }
 0x6de   : > { %v3776_v18 = vpop.f32.mrf.mxu0 }
 0x6df   : > { %v4049_v18 = vld [vmem:[%s5090_s21 + $0x8c] ss:$16 sps:$4 sm:$0xff]  }
 0x6e0   : > { %v2055_v20 = vpop.f32.mrf.mxu0 }
 0x6e1   : > { %v4052_v20 = vld [vmem:[%s5090_s21 + $0x64] ss:$16 sps:$4 sm:$0xff]  }
 0x6e2   : > { %v3777_v11 = vpop.f32.mrf.mxu0  ;;  %v2098_v19 = vpop.f32.mrf.mxu1  ;;  %2626 = vmatprep.subr.bf16.mxu0 %v4052_v20  ;;  %v4099_v20 = vld [vmem:[%s5110_s22 + $0xc8] sm:$0xff]  }
 0x6e3   : > { %v2293_v21 = vpack.c.bf16 %v2098_v19, %v2052_v17  ;;  %v4047_v17 = vld [vmem:[%s5090_s21 + $0x88] ss:$16 sps:$4 sm:$0xff]   ;;  %v4055_v11 = vld [vmem:[%s5090_s21 + $0x6c] ss:$16 sps:$4 sm:$0xff]   ;;  %v4050_v19 = vld [vmem:[%s5090_s21 + $0x60] ss:$16 sps:$4 sm:$0xff]  }
 0x6e4   : > { %v3782_v22 = vpop.f32.mrf.mxu1  ;;  %2627 = vmatpush1.bf16.msra.mxu0 %v4050_v19  ;;  %v4101_v19 = vld [vmem:[%s5110_s22 + $0x88] sm:$0xff]  }
 0x6e5   : > { %3813 = vmatmul.mubr.msk.bf16.vlgmr.msra.gmra.mxu1 %vm1269_vm3, %v2293_v21  ;;  %v4053_v21 = vld [vmem:[%s5090_s21 + $0x68] ss:$16 sps:$4 sm:$0xff]   ;;  %v4058_v22 = vld [vmem:[%s5090_s21 + $0x44] ss:$16 sps:$4 sm:$0xff]  }
 0x6e6   : > { %v2101_v23 = vpop.f32.mrf.mxu1  ;;  %2693 = vmatprep.mubr.bf16.mxu1 %v4579_v34  ;;  %2662 = vmatpush1.bf16.msra.mxu1 %v4029_v55  ;;  %v4077_v55 = vld [vmem:[%s5110_s22 + $0xb8] sm:$0xff]  }
 0x6e7   : > { %2663 = vmatprep.subr.bf16.mxu1 %v4037_v8  ;;  %v4061_v23 = vld [vmem:[%s5090_s21 + $0x4c] ss:$16 sps:$4 sm:$0xff]   ;;  %2628 = vmatprep.subr.bf16.mxu0 %v4058_v22  ;;  %v4088_v8 = vld [vmem:[%s5110_s22 + $0x20] sm:$0xff]  }
 0x6e8   : > { %v3783_v25 = vpop.f32.mrf.mxu1  ;;  %v4103_v22 = vld [vmem:[%s5110_s22 + $0xc0] sm:$0xff]  }
 0x6e9   : > { %v4056_v25 = vld [vmem:[%s5090_s21 + $0x40] ss:$16 sps:$4 sm:$0xff]  }
 0x6ea   : > { %2664 = vmatpush1.bf16.msra.mxu1 %v4035_v24  ;;  %2629 = vmatpush1.bf16.msra.mxu0 %v4056_v25  ;;  %v4090_v24 = vld [vmem:[%s5110_s22 + $0x58] sm:$0xff]   ;;  %v4105_v25 = vld [vmem:[%s5110_s22 + $0x80] sm:$0xff]  }
 0x6eb   : > { %2665 = vmatprep.subr.bf16.mxu1 %v4043_v12  ;;  %v4092_v12 = vld [vmem:[%s5110_s22 + $0x18] sm:$0xff]  }
 0x6ee   : > { %2666 = vmatpush1.bf16.msra.mxu1 %v4041_v14  ;;  %v4094_v14 = vld [vmem:[%s5110_s22 + $0x50] sm:$0xff]  }
 0x6ef   : > { %2667 = vmatprep.subr.bf16.mxu1 %v4049_v18  ;;  %v4098_v18 = vld [vmem:[%s5110_s22 + $0x48] sm:$0xff]  }
 0x6f0   : > { %v2227_v26 = vpop.f32.mrf.mxu1 }
 0x6f2   : > { %v3798_v27 = vpop.f32.mrf.mxu1  ;;  %2668 = vmatpush1.bf16.msra.mxu1 %v4047_v17  ;;  %v4097_v17 = vld [vmem:[%s5110_s22 + $0x90] sm:$0xff]  }
 0x6f3   : > { %2669 = vmatprep.subr.bf16.mxu1 %v4055_v11  ;;  %v4064_v27 = vld [vmem:[%s5090_s21 + $0x24] ss:$16 sps:$4 sm:$0xff]   ;;  %v4100_v11 = vld [vmem:[%s5110_s22 + $0x8] sm:$0xff]  }
 0x6f4   : > { %v2230_v29 = vpop.f32.mrf.mxu1  ;;  %2630 = vmatprep.subr.bf16.mxu0 %v4064_v27  ;;  %v2452_v27 = vsub.s32 3, %v5169_v61 }
 0x6f6   : > { %v3799_v30 = vpop.f32.mrf.mxu1  ;;  %2670 = vmatpush1.bf16.msra.mxu1 %v4053_v21  ;;  %v4102_v21 = vld [vmem:[%s5110_s22 + $0x40] sm:$0xff]  }
 0x6f7   : > { %2671 = vmatprep.subr.bf16.mxu1 %v4061_v23  ;;  %v4062_v30 = vld [vmem:[%s5090_s21 + $0x20] ss:$16 sps:$4 sm:$0xff]  }
 0x6f8   : > { %2631 = vmatpush1.bf16.msra.mxu0 %v4062_v30  ;;  %v4104_v23 = vld [vmem:[%s5110_s22] sm:$0xff]  }
 0x771   : > { %v2171_v32 = vpop.f32.mrf.mxu0 }
 0x772   : > { %v2228_v39 = vadd.f32 %v2227_v26, %v2171_v32  ;;  %v4059_v26 = vld [vmem:[%s5090_s21 + $0x48] ss:$16 sps:$4 sm:$0xff]  }
 0x773   : > { %v3790_v33 = vpop.f32.mrf.mxu0  ;;  %2672 = vmatpush1.bf16.msra.mxu1 %v4059_v26  ;;  %v4065_v32 = vld [vmem:[%s5090_s21 + $0x28] ss:$16 sps:$4 sm:$0xff]  }
 0x774   : > { %v4070_v33 = vld [vmem:[%s5090_s21 + $0x4] ss:$16 sps:$4 sm:$0xff]   ;;  %v2436_v26 = vld [vmem:[%s5108_s0] sm:$0xf] }
 0x775   : > { %v2174_v28 = vpop.f32.mrf.mxu0  ;;  %2632 = vmatprep.subr.bf16.mxu0 %v4070_v33  ;;  %v2449_v30 = vrot.slane %v2436_v26, %v965_v1 }
 0x776   : > { %v2231_v42 = vadd.f32 %v2230_v29, %v2174_v28  ;;  %v4067_v29 = vld [vmem:[%s5090_s21 + $0x2c] ss:$16 sps:$4 sm:$0xff]  }
 0x777   : > { %v3791_v35 = vpop.f32.mrf.mxu0  ;;  %2673 = vmatprep.subr.bf16.mxu1 %v4067_v29  ;;  %v4073_v28 = vld [vmem:[%s5090_s21 + $0xc] ss:$16 sps:$4 sm:$0xff]   ;;  %v2441_v29 = vrot.slane %v2436_v26, %v957_v62 }
 0x778   : > { %v4068_v35 = vld [vmem:[%s5090_s21] ss:$16 sps:$4 sm:$0xff]   ;;  %2674 = vmatpush1.bf16.msra.mxu1 %v4065_v32 }
 0x779   : > { %v2284_v31 = vpop.f32.mrf.mxu0  ;;  %2675 = vmatprep.subr.bf16.mxu1 %v4073_v28  ;;  %2633 = vmatpush1.bf16.msra.mxu0 %v4068_v35  ;;  %v2445_v28 = vrot.slane %v2436_v26, %v961_v63  ;;  %v2453_v35 = vrot.slane %v2436_v26, %v2452_v27 }
 0x77a   : > { %v2291_v40 = vadd.f32 %v2284_v31, %v2228_v39  ;;  %v4071_v31 = vld [vmem:[%s5090_s21 + $0x8] ss:$16 sps:$4 sm:$0xff]  }
 0x77b   : > { %v3806_v36 = vpop.f32.mrf.mxu0 }
 0x77c   : > { %2676 = vmatpush1.bf16.msra.mxu1 %v4071_v31 }
 0x77d   : > { %v2287_v37 = vpop.f32.mrf.mxu0  ;;  %3646 = vmatprep.subr.bf16.mxu1 %v4075_v56 }
 0x77e   : > { %v2292_v45 = vadd.f32 %v2287_v37, %v2231_v42 }
 0x77f   : > { %v3807_v38 = vpop.f32.mrf.mxu0 }
 0x7a5   : > { %v2343_v41 = vpop.f32.mrf.mxu1 }
 0x7a6   : > { %v2350_v34 = vadd.f32 %v2343_v41, %v2291_v40 }
 0x7a7   : > { %v3814_v43 = vpop.f32.mrf.mxu1 }
 0x7a8   : > { %v2352_v47 = vadd.f32 %v4162_v46, %v2350_v34  ;;  %v3494_v43 = vld [vmem:[%s738_s18] ss:$0 sm:$0xff]  ;;  %s5555_s18 = sld [smem:[#allocation41_spill]] (!%p3561_p4) }
 0x7a9   : > { %v2346_v48 = vpop.f32.mrf.mxu1 }
 0x7aa   : > { %v2351_v49 = vadd.f32 %v2346_v48, %v2292_v45  ;;  %v5347_v50 = vadd.f32 %v3493_v44, %v2352_v47  ;;  %v3495_v47 = vld [vmem:[%s746_s5] ss:$0 sm:$0xff] }
 0x7ab   : > { %v3815_v51 = vpop.f32.mrf.mxu1 }
 0x7ac   : > { %v2353_v53 = vadd.f32 %v4163_v52, %v2351_v49  ;;  %2365 = vadd.xlane.f32.xlu1 %v5347_v50 }
 0x7ae   : > { %v5350_v54 = vadd.f32 %v3493_v44, %v2353_v53  ;;  %v4074_v53 = vld [vmem:[%s5110_s22 + $0x78] sm:$0xff]  }
 0x7af   : > { %3624 = vmatprep.subr.bf16.mxu0 %v4074_v53 }
 0x7b0   : > { %2367 = vadd.xlane.f32.xlu0 %v5350_v54 }
 0x835   : > { %v2366_v59 = vpop.xlane.xlu1 %2365 }
 0x836   : > { %v2369_v60 = vmul.f32 0.0078125, %v2366_v59  ;;  %v4079_v59 = vld [vmem:[%s5110_s22 + $0xf0] sm:$0xff]  }
 0x838   : > { %v5358_v0 = vsub.f32 %v5347_v50, %v2369_v60  ;;  %v4080_v60 = vld [vmem:[%s5110_s22 + $0x30] sm:$0xff]  }
 0x839   : > { %v2368_v2 = vpop.xlane.xlu0 %2367 }
 0x83a   : > { %v2370_v3 = vmul.f32 0.0078125, %v2368_v2  ;;  %v2373_v4 = vmul.f32 %v5358_v0, %v5358_v0  ;;  %v4082_v2 = vld [vmem:[%s5110_s22 + $0x68] sm:$0xff]  }
 0x83c   : > { %v5363_v5 = vsub.f32 %v5350_v54, %v2370_v3  ;;  %2375 = vadd.xlane.f32.xlu0 %v2373_v4  ;;  %v4083_v3 = vld [vmem:[%s5110_s22 + $0xe8] sm:$0xff]  }
 0x83d   : > { %v4084_v4 = vld [vmem:[%s5110_s22 + $0x28] sm:$0xff]  }
 0x83e   : > { %v2374_v6 = vmul.f32 %v5363_v5, %v5363_v5 }
 0x840   : > { %2377 = vadd.xlane.f32.xlu0 %v2374_v6  ;;  %v4086_v6 = vld [vmem:[%s5110_s22 + $0x60] sm:$0xff]  }
 0x8c5   : > { %v2376_v36 = vpop.xlane.xlu0 %2375 }
 0x8c6   : > { %v2379_v37 = vmul.f32 0.0078125, %v2376_v36 }
 0x8c8   : > { %v2381_v38 = vadd.f32 1e-05, %v2379_v37 }
 0x8c9   : > { %v2378_v39 = vpop.xlane.xlu0 %2377 }
 0x8ca   : > { %4142 = vrsqrt.f32 %v2381_v38  ;;  %v2380_v40 = vmul.f32 0.0078125, %v2378_v39 }
 0x8cc   : > { %v2382_v41 = vadd.f32 1e-05, %v2380_v40 }
 0x8ce   : > { %4144 = vrsqrt.f32 %v2382_v41 }
 0x8d7   : > { %v4143_v42 = vpop.eup %4142 }
 0x8d8   : > { %v2385_v34 = vmul.f32 %v4143_v42, %v5358_v0  ;;  %v4081_v0 = vld [vmem:[%s5110_s22 + $0xb0] sm:$0xff]  }
 0x8da   : > { %v2393_v46 = vmul.f32 %v3494_v43, %v2385_v34 }
 0x8db   : > { %v4145_v44 = vpop.eup %4144 }
 0x8dc   : > { %v2386_v45 = vmul.f32 %v4145_v44, %v5363_v5  ;;  %v2401_v49 = vadd.f32 %v3495_v47, %v2393_v46  ;;  %v4085_v5 = vld [vmem:[%s5110_s22 + $0xa8] sm:$0xff]  }
 0x8de   : > { %v2394_v48 = vmul.f32 %v3494_v43, %v2386_v45 }
 0x8e0   : > { %v2402_v51 = vadd.f32 %v3495_v47, %v2394_v48 }
 0x8e2   : > { %v2403_v52 = vpack.c.bf16 %v2402_v51, %v2401_v49 }
 0x8e4   : > { %2651 = vmatmul.mubr.bf16.vlgmr.msra.gmra.mxu0 %v2403_v52  ;;  %2694 = vmatmul.mubr.bf16.vlgmr.msra.gmra.mxu1 %v2403_v52 }
 0x8e5   : > { %3625 = vmatpush3.bf16.msra.mxu0 %v4076_v57  ;;  %3647 = vmatpush3.bf16.msra.mxu1 %v4077_v55 }
 0x8e6   : > { %3626 = vmatprep.subr.bf16.mxu0 %v4078_v58  ;;  %3648 = vmatprep.subr.bf16.mxu1 %v4079_v59 }
 0x8e9   : > { %3627 = vmatpush3.bf16.msra.mxu0 %v4080_v60  ;;  %3649 = vmatpush3.bf16.msra.mxu1 %v4081_v0 }
 0x8ea   : > { %3628 = vmatprep.subr.bf16.mxu0 %v4082_v2  ;;  %3650 = vmatprep.subr.bf16.mxu1 %v4083_v3 }
 0x8ed   : > { %3629 = vmatpush3.bf16.msra.mxu0 %v4084_v4  ;;  %3651 = vmatpush3.bf16.msra.mxu1 %v4085_v5 }
 0x8ee   : > { %3630 = vmatprep.subr.bf16.mxu0 %v4086_v6  ;;  %3652 = vmatprep.subr.bf16.mxu1 %v4087_v7 }
 0x8f1   : > { %3631 = vmatpush3.bf16.msra.mxu0 %v4088_v8  ;;  %3653 = vmatpush3.bf16.msra.mxu1 %v4089_v9 }
 0x8f2   : > { %3632 = vmatprep.subr.bf16.mxu0 %v4090_v24  ;;  %3654 = vmatprep.subr.bf16.mxu1 %v4091_v10 }
 0x8f5   : > { %3633 = vmatpush3.bf16.msra.mxu0 %v4092_v12  ;;  %3655 = vmatpush3.bf16.msra.mxu1 %v4093_v13 }
 0x8f6   : > { %3634 = vmatprep.subr.bf16.mxu0 %v4094_v14  ;;  %3656 = vmatprep.subr.bf16.mxu1 %v4095_v15 }
 0x8f9   : > { %3635 = vmatpush3.bf16.msra.mxu0 %v4096_v16  ;;  %3657 = vmatpush3.bf16.msra.mxu1 %v4097_v17 }
 0x8fa   : > { %3636 = vmatprep.subr.bf16.mxu0 %v4098_v18  ;;  %3658 = vmatprep.subr.bf16.mxu1 %v4099_v20 }
 0x8fd   : > { %3637 = vmatpush3.bf16.msra.mxu0 %v4100_v11  ;;  %3659 = vmatpush3.bf16.msra.mxu1 %v4101_v19 }
 0x8fe   : > { %3638 = vmatprep.subr.bf16.mxu0 %v4102_v21  ;;  %3660 = vmatprep.subr.bf16.mxu1 %v4103_v22 }
 0x901   : > { %3639 = vmatpush3.bf16.msra.mxu0 %v4104_v23  ;;  %3661 = vmatpush3.bf16.msra.mxu1 %v4105_v25 }
 0x9a4   : > { %v2652_v32 = vpop.f32.mrf.mxu0  ;;  %v2695_v33 = vpop.f32.mrf.mxu1 }
 0x9a5   : > { %v2653_v31 = vadd.f32 %v2652_v32, %v2441_v29  ;;  %v2696_v36 = vadd.f32 %v2695_v33, %v2449_v30 }
 0x9a6   : > { %v2654_v37 = vpop.f32.mrf.mxu0  ;;  %v2697_v38 = vpop.f32.mrf.mxu1 }
 0x9a7   : > { %v2712_v39 = vmul.f32 0.70710677, %v2653_v31  ;;  %v2714_v40 = vmul.f32 0.70710677, %v2696_v36  ;;  %v2655_v41 = vadd.f32 %v2654_v37, %v2445_v28  ;;  %v2698_v42 = vadd.f32 %v2697_v38, %v2453_v35 }
 0x9a8   : > { %v2656_v34 = vpop.f32.mrf.mxu0  ;;  %v2699_v43 = vpop.f32.mrf.mxu1  ;;  %v2704_v60 = vmul.f32 0.5, %v2653_v31  ;;  %v2706_v18 = vmul.f32 0.5, %v2696_v36 }
 0x9a9   : > { %v2657_v62 = vadd.f32 %v2656_v34, %v2441_v29  ;;  %v2700_v44 = vadd.f32 %v2699_v43, %v2449_v30  ;;  %4146 = verf.f32 %v2712_v39  ;;  %v2713_v1 = vmul.f32 0.70710677, %v2655_v41 }
 0x9aa   : > { %v2658_v45 = vpop.f32.mrf.mxu0  ;;  %v2701_v46 = vpop.f32.mrf.mxu1  ;;  %4148 = verf.f32 %v2714_v40  ;;  %v2715_v61 = vmul.f32 0.70710677, %v2698_v42  ;;  %v2705_v0 = vmul.f32 0.5, %v2655_v41  ;;  %v2707_v14 = vmul.f32 0.5, %v2698_v42 }
 0x9ab   : > { %v2716_v63 = vmul.f32 0.70710677, %v2657_v62  ;;  %4150 = verf.f32 %v2713_v1  ;;  %v2718_v47 = vmul.f32 0.70710677, %v2700_v44  ;;  %v2659_v48 = vadd.f32 %v2658_v45, %v2445_v28  ;;  %v3528_v28 = vld [vmem:[%s859_s28] ss:$0 sm:$0xff] }
 0x9ac   : > { %v2702_v49 = vadd.f32 %v2701_v46, %v2453_v35  ;;  %4152 = verf.f32 %v2715_v61  ;;  %v2708_v7 = vmul.f32 0.5, %v2657_v62  ;;  %v2710_v10 = vmul.f32 0.5, %v2700_v44 }
 0x9ad   : > { %4154 = verf.f32 %v2716_v63  ;;  %v2717_v51 = vmul.f32 0.70710677, %v2659_v48  ;;  %v2709_v12 = vmul.f32 0.5, %v2659_v48 }
 0x9ae   : > { %4156 = verf.f32 %v2718_v47  ;;  %v2719_v52 = vmul.f32 0.70710677, %v2702_v49  ;;  %v2711_v16 = vmul.f32 0.5, %v2702_v49 }
 0x9af   : > { %4158 = verf.f32 %v2717_v51 }
 0x9b0   : > { %4160 = verf.f32 %v2719_v52 }
 0x9b6   : > { %v4147_v53 = vpop.eup %4146 }
 0x9b7   : > { %v4149_v56 = vpop.eup %4148  ;;  %v2728_v5 = vadd.f32 1.0, %v4147_v53 }
 0x9b8   : > { %v4151_v57 = vpop.eup %4150  ;;  %v2730_v24 = vadd.f32 1.0, %v4149_v56 }
 0x9b9   : > { %v4153_v55 = vpop.eup %4152  ;;  %v2729_v2 = vadd.f32 1.0, %v4151_v57  ;;  %v2736_v21 = vmul.f32 %v2728_v5, %v2704_v60 }
 0x9ba   : > { %v4155_v58 = vpop.eup %4154  ;;  %v2731_v6 = vadd.f32 1.0, %v4153_v55  ;;  %v2738_v25 = vmul.f32 %v2730_v24, %v2706_v18 }
 0x9bb   : > { %v4157_v59 = vpop.eup %4156  ;;  %v2732_v3 = vadd.f32 1.0, %v4155_v58  ;;  %v2737_v20 = vmul.f32 %v2729_v2, %v2705_v0 }
 0x9bc   : > { %v4159_v4 = vpop.eup %4158  ;;  %v2734_v8 = vadd.f32 1.0, %v4157_v59  ;;  %v2739_v22 = vmul.f32 %v2731_v6, %v2707_v14 }
 0x9bd   : > { %v4161_v9 = vpop.eup %4160  ;;  %v2733_v13 = vadd.f32 1.0, %v4159_v4  ;;  %v2740_v15 = vmul.f32 %v2732_v3, %v2708_v7 }
 0x9be   : > { %v2735_v17 = vadd.f32 1.0, %v4161_v9  ;;  %v2742_v11 = vmul.f32 %v2734_v8, %v2710_v10 }
 0x9bf   : > { %v2741_v19 = vmul.f32 %v2733_v13, %v2709_v12  ;;  %v2744_v27 = vpack.c.bf16 %v2740_v15, %v2736_v21 }
 0x9c0   : > { %v2743_v23 = vmul.f32 %v2735_v17, %v2711_v16  ;;  %v2746_v30 = vpack.c.bf16 %v2742_v11, %v2738_v25 }
 0x9c1   : > { %v2745_v26 = vpack.c.bf16 %v2741_v19, %v2737_v20 }
 0x9c2   : > { %v2747_v29 = vpack.c.bf16 %v2743_v23, %v2739_v22 }
 0x9c3   : > { %3043 = vmatprep.mubr.bf16.mxu0 %v2745_v26 }
 0x9c4   : > { %3084 = vmatprep.mubr.bf16.mxu1 %v2747_v29  ;;  %3044 = vmatmul.mubr.bf16.vlgmr.msra.gmra.mxu0 %v2744_v27 }
 0x9c5   : > { %3085 = vmatmul.mubr.bf16.vlgmr.msra.gmra.mxu1 %v2746_v30 }
 0xa84   : > { %v3640_v32 = vpop.f32.mrf.mxu0 }
 0xa85   : > { %v3662_v33 = vpop.f32.mrf.mxu1 }
 0xa86   : > { %v3641_v35 = vpop.f32.mrf.mxu0 }
 0xa87   : > { %v3642_v31 = vadd.f32 %v3641_v35, %v3640_v32  ;;  %v3663_v36 = vpop.f32.mrf.mxu1 }
 0xa88   : > { %v3643_v37 = vpop.f32.mrf.mxu0  ;;  %v3664_v39 = vadd.f32 %v3663_v36, %v3662_v33 }
 0xa89   : > { %v3046_v38 = vadd.f32 %v3642_v31, %v3528_v28  ;;  %v3665_v40 = vpop.f32.mrf.mxu1 }
 0xa8a   : > { %v3644_v41 = vpop.f32.mrf.mxu0 }
 0xa8b   : > { %v3087_v42 = vadd.f32 %v3664_v39, %v3046_v38  ;;  %v3645_v34 = vadd.f32 %v3644_v41, %v3643_v37  ;;  %v3666_v43 = vpop.f32.mrf.mxu1 }
 0xa8c   : > { %v3667_v1 = vadd.f32 %v3666_v43, %v3665_v40 }
 0xa8d   : > { %v3093_v62 = vadd.f32 %v3087_v42, %v5347_v50  ;;  %v3049_v44 = vadd.f32 %v3645_v34, %v3528_v28 }
 0xa8f   : > { %3095 = vst [vmem:[#allocation21] sm:$0xff] %v3093_v62  ;;  %v3090_v45 = vadd.f32 %v3667_v1, %v3049_v44  ;;  %3100 = sbr.rel (%p3561_p4) target bundleno = 3019 (0xbcb), region = 132 }
 0xa91   : > { %v3094_v46 = vadd.f32 %v3090_v45, %v5350_v54 }
 0xa93   : > { %3096 = vst [vmem:[#allocation21 + $0x8] sm:$0xff] %v3094_v46 }
 0xa94   : > { %3103 = vadd.xlane.f32.xlu0 %v3093_v62  ;;  %v3562_v60 = vld [vmem:[%s5555_s18] ss:$0 sm:$0xff] }
 0xa95   : > { %v3563_v2 = vld [vmem:[%s5556_s20] ss:$0 sm:$0xff] }
 0xa98   : > { %3105 = vadd.xlane.f32.xlu0 %v3094_v46 }
 0xb1d   : > { %v3104_v61 = vpop.xlane.xlu0 %3103 }
 0xb1e   : > { %v3107_v63 = vmul.f32 0.0078125, %v3104_v61 }
 0xb20   : > { %v3109_v47 = vsub.f32 %v3093_v62, %v3107_v63 }
 0xb21   : > { %v3106_v48 = vpop.xlane.xlu0 %3105 }
 0xb22   : > { %v3108_v49 = vmul.f32 0.0078125, %v3106_v48  ;;  %v3111_v51 = vmul.f32 %v3109_v47, %v3109_v47 }
 0xb24   : > { %v3110_v52 = vsub.f32 %v3094_v46, %v3108_v49  ;;  %3113 = vadd.xlane.f32.xlu1 %v3111_v51 }
 0xb26   : > { %v3112_v50 = vmul.f32 %v3110_v52, %v3110_v52 }
 0xb28   : > { %3115 = vadd.xlane.f32.xlu1 %v3112_v50 }
 0xbad   : > { %v3114_v53 = vpop.xlane.xlu1 %3113 }
 0xbae   : > { %v3117_v56 = vmul.f32 0.0078125, %v3114_v53 }
 0xbb0   : > { %v3119_v57 = vadd.f32 1e-05, %v3117_v56 }
 0xbb1   : > { %v3116_v54 = vpop.xlane.xlu1 %3115 }
 0xbb2   : > { %4164 = vrsqrt.f32 %v3119_v57  ;;  %v3118_v55 = vmul.f32 0.0078125, %v3116_v54 }
 0xbb4   : > { %v3120_v58 = vadd.f32 1e-05, %v3118_v55 }
 0xbb6   : > { %4166 = vrsqrt.f32 %v3120_v58 }
 0xbbf   : > { %v4165_v59 = vpop.eup %4164 }
 0xbc0   : > { %v3123_v0 = vmul.f32 %v4165_v59, %v3109_v47 }
 0xbc2   : > { %v3131_v3 = vmul.f32 %v3562_v60, %v3123_v0 }
 0xbc3   : > { %v4167_v4 = vpop.eup %4166 }
 0xbc4   : > { %v3139_v5 = vadd.f32 %v3563_v2, %v3131_v3  ;;  %v3124_v6 = vmul.f32 %v4167_v4, %v3110_v52 }
 0xbc6   : > { %3141 = vst [vmem:[#allocation21] sm:$0xff] %v3139_v5  ;;  %v3132_v7 = vmul.f32 %v3562_v60, %v3124_v6 }
 0xbc8   : > { %v3140_v8 = vadd.f32 %v3563_v2, %v3132_v7 }
 0xbca   : > { %3142 = vst [vmem:[#allocation21 + $0x8] sm:$0xff] %v3140_v8 }
 0xbcb PF: > { %p3888_p9 = scmp.eq.s32.totalorder %s4894_s10, 3  ;;  %s4584_s21 = smov [#allocation21]  }
 0xbcc   : > { %s3149_s15 = sshll.u32 %s4584_s21, 4  ;;  %s3150_s15 = int_to_ptr.vmem [resolvable:$true] %s3149_s15 }
 0xbcd   : > { %s4474_s30 = scalar_lea.vmem %s3150_s15, 256  ;;  %p4481_p3 = scmp.lt.s32.totalorder %s3150_s15, %s3150_s15 }
 0xbce   : > { %p4475_p11 = scmp.ne.s32.totalorder %s3150_s15, %s4474_s30  ;;  %p4482_p6 = scmp.lt.s32.totalorder %s4474_s30, %s4474_s30 }
 0xbd0   : > { %p4476_p2 = pnand %p4475_p11, %p3888_p9  ;;  %p4483_p8 = por %p4482_p6, %p4481_p3 }
 0xbd2   : > { %p4477_p10 = pneg %p4476_p2 }
 0xbd4   : > { %p4484_p7 = pnand %p4483_p8, %p4477_p10 }
 0xbd6   : > { %4487 = shalt.err (!%p4484_p7)
}
 0xbd7   : > { %s4585_s3 = smov 128   ;;  %s4586_s26 = smov 8  }
 0xbd8   : > { %s5557_s29 = sld [smem:[#allocation43_spill]] }
 0xbde   : > { %3847 = dma.vmem_to_hbm [thread:$0]  (%p3888_p9), %s3150_s15, 256, %s5557_s29, [#allocation5], %s4585_s3, %s4585_s3, %s4586_s26  }
 0xbdf   : > { %4539 = dma.done.wait (%p3888_p9), [#allocation5], 256  }
 0xbe0   : > { %4541 = vsyncadd (%p3888_p9), [#allocation5], 4294967040 }
 0xbe1 PF: > { %s5558_s21 = sld [smem:[#allocation30_spill]]  ;;  %s5561_s18 = smov %s4548_s19 }
 0xbe2   : > { %s5559_s14 = sld [smem:[#allocation29_spill]] }
 0xbe3   : > { %s5560_s20 = sld [smem:[#allocation31_spill]] }
 0xbe7   : > { %p39_p13 = scmp.ge.s32.totalorder %s5558_s21, 6  }
 0xbe8   : > { %s5562_s19 = smov %s5559_s14 }
 0xbe9   :  { %41 = sbr.rel (!%p39_p13) target bundleno = 25 (0x19), region = 243 }
 0xbee   :  { %3165 = vsyncpa [#allocation4], 1 }
 0xbef   :  { %3167 = vsyncpa [#allocation4 + $0x1], 1 }
 0xbf0   :  { %3168 = vsyncpa [#allocation7], 1 }
 0xbf1   :  { %3170 = vsyncpa [#allocation7 + $0x1], 1 }
 0xbf2   :  { %3171 = vsyncpa [#allocation10], 1 }
 0xbf3   :  { %3173 = vsyncpa [#allocation10 + $0x1], 1 }
 0xbf4   :  { %3174 = vsyncpa [#allocation13], 1 }
 0xbf5   :  { %3176 = vsyncpa [#allocation13 + $0x1], 1 }
 0xbf6   :  { %3177 = vsyncpa [#allocation16], 1 }
 0xbf7   :  { %3179 = vsyncpa [#allocation16 + $0x1], 1 }
 0xbf8   :  { %3180 = vsyncpa [#allocation19], 1 }
 0xbf9   :  { %3182 = vsyncpa [#allocation19 + $0x1], 1 }
 0xbfa   :  { %3183 = vsyncpa [#allocation5], 1 }
 0xbfb   :  { %3185 = vsyncpa [#allocation5 + $0x1], 1 }

</bundles_post_ra>
